<compile_context>
chip_gen: v6e
topology: v6e:2x2x1
jax: 0.10.0
libtpu: 0.0.40
codegen_flags: <defaults>
</compile_context>

<pallas_src>
import functools

import jax
import jax.numpy as jnp
from jax.experimental import pallas as pl
from jax.experimental.pallas import tpu as pltpu


BP = 8  # padded sentence-batch (sublane) width for the first-level LSTM


def _vmem():
    # whole-array block, resident in VMEM (all operands here are tiny)
    return pl.BlockSpec(memory_space=pltpu.MemorySpace.VMEM)


# ------------------------------ fused kernel ------------------------------- #

def _lstm_cell(gates, c, H):
    """PyTorch gate order (i, f, g, o). Full-vreg-width activations, then slice."""
    sig = jax.nn.sigmoid(gates)     # one EUP pass over all 4H lanes
    tnh = jnp.tanh(gates)           # one EUP pass over all 4H lanes
    i = sig[:, 0:H]
    f = sig[:, H:2 * H]
    o = sig[:, 3 * H:4 * H]
    g = tnh[:, 2 * H:3 * H]
    c_new = f * c + i * g
    h_new = o * jnp.tanh(c_new)
    return h_new, c_new


def _fused_forward_kernel(x_ref, wcomb_ref, whh1_ref, b1_ref,
                          wih2_ref, whh2_ref, b2_ref,
                          wlin1_ref, wlin2_ref, blin_ref,
                          o_ref, *, T, S, H1, H2):
    """Entire TwoLevelLstmClassifier forward in one kernel.

    x_ref    : [T*BP, V]   one-hot tokens, view-ordered (row t*BP + s), batch padded to BP
    wcomb    : [V, 4H1]    W_emb^T @ W_ih1^T  (embedding folded into input projection)
    whh1     : [H1, 4H1]   transposed weight_hh of LSTM1
    b1       : [1, 4H1]    b_ih1 + b_hh1
    wih2     : [H1, 4H2]   transposed weight_ih of LSTM2
    whh2     : [H2, 4H2]   transposed weight_hh of LSTM2
    b2       : [1, 4H2]    b_ih2 + b_hh2
    wlin1    : [S*H1, L]   classifier weight (h_n part), transposed
    wlin2    : [H2, L]     classifier weight (hn_seqs part), transposed
    blin     : [1, L]
    o_ref    : [1, L]
    """
    # ---- hoisted weight loads (once, outside the recurrences) ----
    wcomb = wcomb_ref[...]
    whh1 = whh1_ref[...]
    b1 = b1_ref[...]
    wih2 = wih2_ref[...]
    whh2 = whh2_ref[...]
    b2 = b2_ref[...]

    # ---- LSTM1 input projection for ALL tokens in one MXU pass (embedding folded in) ----
    gx1 = jnp.dot(x_ref[...], wcomb, preferred_element_type=jnp.float32) + b1  # [T*BP, 4H1]

    # ---- LSTM1 recurrence, fully unrolled; only h @ Whh on the serial path ----
    h1 = jnp.zeros((BP, H1), jnp.float32)
    c1 = jnp.zeros((BP, H1), jnp.float32)
    for t in range(T):
        gates = gx1[t * BP:(t + 1) * BP, :] + jnp.dot(
            h1, whh1, preferred_element_type=jnp.float32)
        h1, c1 = _lstm_cell(gates, c1, H1)
    # rows [0:S] of h1 == h_n (last hidden state per sentence); rows >= S are padding

    # ---- LSTM2: input projection hoisted out of the recurrence ----
    gx2 = jnp.dot(h1, wih2, preferred_element_type=jnp.float32) + b2            # [BP, 4H2]

    h2 = jnp.zeros((1, H2), jnp.float32)
    c2 = jnp.zeros((1, H2), jnp.float32)
    for s in range(S):
        gates = gx2[s:s + 1, :] + jnp.dot(
            h2, whh2, preferred_element_type=jnp.float32)
        h2, c2 = _lstm_cell(gates, c2, H2)

    # ---- classifier: cat(h_n.view(1, S*H1), hn_seqs) @ W^T + b ----
    # Done without reshaping (S, H1) -> (1, S*H1) in-kernel: split the weight per sentence.
    pred = jnp.dot(h2, wlin2_ref[...], preferred_element_type=jnp.float32) + blin_ref[...]
    w1 = wlin1_ref[...]                                                          # [S*H1, L]
    for s in range(S):
        pred = pred + jnp.dot(h1[s:s + 1, :], w1[s * H1:(s + 1) * H1, :],
                              preferred_element_type=jnp.float32)
    o_ref[...] = pred


# --------------------------- parameter preparation -------------------------- #

def init_params(key, embedding_dim, seq_hidden_dim, seqs_hidden_dim,
                vocab_size, label_size, max_len_seq_lstm):
    ks = jax.random.split(key, 11)
    s = 0.1
    H1, H2, E, V = seq_hidden_dim, seqs_hidden_dim, embedding_dim, vocab_size
    feat = max_len_seq_lstm * H1 + H2
    p = {
        "w_emb": s * jax.random.normal(ks[0], (E, V), jnp.float32),   # nn.Linear(V,E,bias=False)
        "w_ih1": s * jax.random.normal(ks[1], (4 * H1, E), jnp.float32),
        "w_hh1": s * jax.random.normal(ks[2], (4 * H1, H1), jnp.float32),
        "b_ih1": s * jax.random.normal(ks[3], (4 * H1,), jnp.float32),
        "b_hh1": s * jax.random.normal(ks[4], (4 * H1,), jnp.float32),
        "w_ih2": s * jax.random.normal(ks[5], (4 * H2, H1), jnp.float32),
        "w_hh2": s * jax.random.normal(ks[6], (4 * H2, H2), jnp.float32),
        "b_ih2": s * jax.random.normal(ks[7], (4 * H2,), jnp.float32),
        "b_hh2": s * jax.random.normal(ks[8], (4 * H2,), jnp.float32),
        "w_lin": s * jax.random.normal(ks[9], (label_size, feat), jnp.float32),
        "b_lin": s * jax.random.normal(ks[10], (label_size,), jnp.float32),
    }
    return p


def prepare_params(raw):
    """One-time weight prep: fuse embedding into LSTM1 input projection, pre-transpose
    all weights, and pre-sum LSTM biases (kept out of the jitted forward)."""
    H1 = raw["w_hh1"].shape[1]
    H2 = raw["w_hh2"].shape[1]
    L = raw["w_lin"].shape[0]
    s_h1 = raw["w_lin"].shape[1] - H2        # = S * H1
    wcomb = jnp.transpose(                   # [V, 4H1] = W_emb^T @ W_ih1^T
        jnp.dot(raw["w_ih1"], raw["w_emb"], precision=jax.lax.Precision.HIGHEST))
    return {
        "wcomb": wcomb,
        "whh1_t": jnp.transpose(raw["w_hh1"]),                 # [H1, 4H1]
        "b1": (raw["b_ih1"] + raw["b_hh1"]).reshape(1, 4 * H1),
        "wih2_t": jnp.transpose(raw["w_ih2"]),                 # [H1, 4H2]
        "whh2_t": jnp.transpose(raw["w_hh2"]),                 # [H2, 4H2]
        "b2": (raw["b_ih2"] + raw["b_hh2"]).reshape(1, 4 * H2),
        "wlin1_t": jnp.transpose(raw["w_lin"][:, :s_h1]),      # [S*H1, L]
        "wlin2_t": jnp.transpose(raw["w_lin"][:, s_h1:]),      # [H2, L]
        "blin": raw["b_lin"].reshape(1, L),
    }


# ------------------------------ model forward ------------------------------ #

@jax.jit
def two_level_lstm_forward(sequences_onehot, prepped):
    S, T, V = sequences_onehot.shape
    assert S <= BP
    H1 = prepped["whh1_t"].shape[0]
    H2 = prepped["whh2_t"].shape[0]
    L = prepped["blin"].shape[1]

    # torch `.view(max_len_sent, len(sequences), -1)` flat-reinterpretation of the
    # (row-major) [S*T, V] buffer, plus sublane padding of the sentence batch S -> BP.
    xv = sequences_onehot.reshape(T, S, V).astype(jnp.float32)   # xv[t, s] = flat[t*S + s]
    x_pad = jnp.pad(xv, ((0, 0), (0, BP - S), (0, 0)))           # [T, BP, V]
    x_in = x_pad.reshape(T * BP, V)                              # row index t*BP + s

    kernel = functools.partial(_fused_forward_kernel, T=T, S=S, H1=H1, H2=H2)
    return pl.pallas_call(
        kernel,
        out_shape=jax.ShapeDtypeStruct((1, L), jnp.float32),
        in_specs=[_vmem()] * 10,
        out_specs=_vmem(),
    )(x_in, prepped["wcomb"], prepped["whh1_t"], prepped["b1"],
      prepped["wih2_t"], prepped["whh2_t"], prepped["b2"],
      prepped["wlin1_t"], prepped["wlin2_t"], prepped["blin"])


# ------------------------------ pure-JAX reference ------------------------- #

def _lstm_ref(x, w_ih, w_hh, b_ih, b_hh):
    T, B, _ = x.shape
    H = w_hh.shape[1]
    h = jnp.zeros((B, H), jnp.float32)
    c = jnp.zeros((B, H), jnp.float32)
    for t in range(T):
        gates = x[t] @ w_ih.T + h @ w_hh.T + b_ih + b_hh
        i = jax.nn.sigmoid(gates[:, :H])
        f = jax.nn.sigmoid(gates[:, H:2 * H])
        g = jnp.tanh(gates[:, 2 * H:3 * H])
        o = jax.nn.sigmoid(gates[:, 3 * H:])
        c = f * c + i * g
        h = o * jnp.tanh(c)
    return h


def _forward_ref(seq_oh, p, S, T, E, H1, H2):
    emb = seq_oh.reshape(S * T, -1) @ p["w_emb"].T
    x1 = emb.reshape(T, S, E)
    h_n = _lstm_ref(x1, p["w_ih1"], p["w_hh1"], p["b_ih1"], p["b_hh1"])
    hn_seqs = _lstm_ref(h_n.reshape(S, 1, H1), p["w_ih2"], p["w_hh2"],
                        p["b_ih2"], p["b_hh2"])
    feat = jnp.concatenate([h_n.reshape(1, S * H1), hn_seqs.reshape(1, H2)], axis=1)
    return feat @ p["w_lin"].T + p["b_lin"]


# ----------------------------------- main ----------------------------------- #

if __name__ == "__main__":
    # small config consistent with the module's forward
    embedding_dim = 16
    seq_hidden_dim = 32      # H1  (4*H1 = 128 lanes)
    seqs_hidden_dim = 32     # H2  (4*H2 = 128 lanes)
    vocab_size = 32
    label_size = 4
    max_len_seq_lstm = 4     # S: number of sentences
    max_len_sent = 8         # T: tokens per sentence

    key = jax.random.PRNGKey(0)
    k_param, k_tok = jax.random.split(key)

    raw_params = init_params(k_param, embedding_dim, seq_hidden_dim,
                             seqs_hidden_dim, vocab_size, label_size,
                             max_len_seq_lstm)
    prepped = prepare_params(raw_params)   # one-time weight fusion / transposes

    # sequences: token ids [S, T] -> one-hot float [S, T, V] (cfg.if_linear_embedding)
    token_ids = jax.random.randint(k_tok, (max_len_seq_lstm, max_len_sent),
                                   0, vocab_size)
    sequences_onehot = jax.nn.one_hot(token_ids, vocab_size, dtype=jnp.float32)

    pred = two_level_lstm_forward(sequences_onehot, prepped)
    pred = jax.block_until_ready(pred)

    ref = _forward_ref(sequences_onehot, raw_params, max_len_seq_lstm,
                       max_len_sent, embedding_dim, seq_hidden_dim,
                       seqs_hidden_dim)
    assert pred.shape == (1, label_size)
    assert jnp.allclose(pred, ref, atol=1e-4, rtol=1e-4), (pred, ref)

    print("KERNEL_OK")
</pallas_src>

<mosaic_0001>
module attributes {stable_mosaic.version = 11 : i64} {
  func.func @_fused_forward_kernel(%arg0: memref<64x32xf32, #tpu.memory_space<vmem>>, %arg1: memref<32x128xf32, #tpu.memory_space<vmem>>, %arg2: memref<32x128xf32, #tpu.memory_space<vmem>>, %arg3: memref<1x128xf32, #tpu.memory_space<vmem>>, %arg4: memref<32x128xf32, #tpu.memory_space<vmem>>, %arg5: memref<32x128xf32, #tpu.memory_space<vmem>>, %arg6: memref<1x128xf32, #tpu.memory_space<vmem>>, %arg7: memref<128x4xf32, #tpu.memory_space<vmem>>, %arg8: memref<32x4xf32, #tpu.memory_space<vmem>>, %arg9: memref<1x4xf32, #tpu.memory_space<vmem>>, %arg10: memref<1x4xf32, #tpu.memory_space<vmem>>) attributes {dimension_semantics = [], scalar_prefetch = 0 : i64, scratch_operands = 0 : i64, tpu.core_type = #tpu.core_type<tc>} {
    %c0 = arith.constant 0 : index
    %c0_0 = arith.constant 0 : index
    %0 = vector.load %arg1[%c0, %c0_0] : memref<32x128xf32, #tpu.memory_space<vmem>>, vector<32x128xf32>
    %c0_1 = arith.constant 0 : index
    %c0_2 = arith.constant 0 : index
    %1 = vector.load %arg2[%c0_1, %c0_2] : memref<32x128xf32, #tpu.memory_space<vmem>>, vector<32x128xf32>
    %c0_3 = arith.constant 0 : index
    %c0_4 = arith.constant 0 : index
    %2 = vector.load %arg3[%c0_3, %c0_4] : memref<1x128xf32, #tpu.memory_space<vmem>>, vector<1x128xf32>
    %c0_5 = arith.constant 0 : index
    %c0_6 = arith.constant 0 : index
    %3 = vector.load %arg4[%c0_5, %c0_6] : memref<32x128xf32, #tpu.memory_space<vmem>>, vector<32x128xf32>
    %c0_7 = arith.constant 0 : index
    %c0_8 = arith.constant 0 : index
    %4 = vector.load %arg5[%c0_7, %c0_8] : memref<32x128xf32, #tpu.memory_space<vmem>>, vector<32x128xf32>
    %c0_9 = arith.constant 0 : index
    %c0_10 = arith.constant 0 : index
    %5 = vector.load %arg6[%c0_9, %c0_10] : memref<1x128xf32, #tpu.memory_space<vmem>>, vector<1x128xf32>
    %c0_11 = arith.constant 0 : index
    %c0_12 = arith.constant 0 : index
    %6 = vector.load %arg0[%c0_11, %c0_12] : memref<64x32xf32, #tpu.memory_space<vmem>>, vector<64x32xf32>
    %cst = arith.constant dense<0.000000e+00> : vector<64x128xf32>
    %7 = tpu.matmul %6, %0, %cst {dimension_numbers = #tpu.dot_dimension_numbers<[1], [0], [0], [1], [0, 0, 1, 1], [], []>} : vector<64x32xf32>, vector<32x128xf32>, vector<64x128xf32> -> vector<64x128xf32>
    %8 = vector.broadcast %2 : vector<1x128xf32> to vector<64x128xf32>
    %9 = arith.addf %7, %8 : vector<64x128xf32>
    %cst_13 = arith.constant 0.000000e+00 : f32
    %10 = vector.broadcast %cst_13 : f32 to vector<8x32xf32>
    %cst_14 = arith.constant 0.000000e+00 : f32
    %11 = vector.broadcast %cst_14 : f32 to vector<8x32xf32>
    %12 = vector.extract_strided_slice %9 {offsets = [0, 0], sizes = [8, 128], strides = [1, 1]} : vector<64x128xf32> to vector<8x128xf32>
    %cst_15 = arith.constant dense<0.000000e+00> : vector<8x128xf32>
    %13 = tpu.matmul %10, %1, %cst_15 {dimension_numbers = #tpu.dot_dimension_numbers<[1], [0], [0], [1], [0, 0, 1, 1], [], []>} : vector<8x32xf32>, vector<32x128xf32>, vector<8x128xf32> -> vector<8x128xf32>
    %14 = arith.addf %12, %13 : vector<8x128xf32>
    %15 = arith.negf %14 : vector<8x128xf32>
    %16 = math.exp %15 : vector<8x128xf32>
    %cst_16 = arith.constant 1.000000e+00 : f32
    %17 = vector.broadcast %cst_16 : f32 to vector<8x128xf32>
    %18 = arith.addf %17, %16 : vector<8x128xf32>
    %19 = arith.divf %17, %18 : vector<8x128xf32>
    %20 = math.tanh %14 : vector<8x128xf32>
    %21 = vector.extract_strided_slice %19 {offsets = [0, 0], sizes = [8, 32], strides = [1, 1]} : vector<8x128xf32> to vector<8x32xf32>
    %22 = vector.extract_strided_slice %19 {offsets = [0, 32], sizes = [8, 32], strides = [1, 1]} : vector<8x128xf32> to vector<8x32xf32>
    %23 = vector.extract_strided_slice %19 {offsets = [0, 96], sizes = [8, 32], strides = [1, 1]} : vector<8x128xf32> to vector<8x32xf32>
    %24 = vector.extract_strided_slice %20 {offsets = [0, 64], sizes = [8, 32], strides = [1, 1]} : vector<8x128xf32> to vector<8x32xf32>
    %25 = arith.mulf %22, %11 : vector<8x32xf32>
    %26 = arith.mulf %21, %24 : vector<8x32xf32>
    %27 = arith.addf %25, %26 : vector<8x32xf32>
    %28 = math.tanh %27 : vector<8x32xf32>
    %29 = arith.mulf %23, %28 : vector<8x32xf32>
    %30 = vector.extract_strided_slice %9 {offsets = [8, 0], sizes = [8, 128], strides = [1, 1]} : vector<64x128xf32> to vector<8x128xf32>
    %cst_17 = arith.constant dense<0.000000e+00> : vector<8x128xf32>
    %31 = tpu.matmul %29, %1, %cst_17 {dimension_numbers = #tpu.dot_dimension_numbers<[1], [0], [0], [1], [0, 0, 1, 1], [], []>} : vector<8x32xf32>, vector<32x128xf32>, vector<8x128xf32> -> vector<8x128xf32>
    %32 = arith.addf %30, %31 : vector<8x128xf32>
    %33 = arith.negf %32 : vector<8x128xf32>
    %34 = math.exp %33 : vector<8x128xf32>
    %cst_18 = arith.constant 1.000000e+00 : f32
    %35 = vector.broadcast %cst_18 : f32 to vector<8x128xf32>
    %36 = arith.addf %35, %34 : vector<8x128xf32>
    %37 = arith.divf %35, %36 : vector<8x128xf32>
    %38 = math.tanh %32 : vector<8x128xf32>
    %39 = vector.extract_strided_slice %37 {offsets = [0, 0], sizes = [8, 32], strides = [1, 1]} : vector<8x128xf32> to vector<8x32xf32>
    %40 = vector.extract_strided_slice %37 {offsets = [0, 32], sizes = [8, 32], strides = [1, 1]} : vector<8x128xf32> to vector<8x32xf32>
    %41 = vector.extract_strided_slice %37 {offsets = [0, 96], sizes = [8, 32], strides = [1, 1]} : vector<8x128xf32> to vector<8x32xf32>
    %42 = vector.extract_strided_slice %38 {offsets = [0, 64], sizes = [8, 32], strides = [1, 1]} : vector<8x128xf32> to vector<8x32xf32>
    %43 = arith.mulf %40, %27 : vector<8x32xf32>
    %44 = arith.mulf %39, %42 : vector<8x32xf32>
    %45 = arith.addf %43, %44 : vector<8x32xf32>
    %46 = math.tanh %45 : vector<8x32xf32>
    %47 = arith.mulf %41, %46 : vector<8x32xf32>
    %48 = vector.extract_strided_slice %9 {offsets = [16, 0], sizes = [8, 128], strides = [1, 1]} : vector<64x128xf32> to vector<8x128xf32>
    %cst_19 = arith.constant dense<0.000000e+00> : vector<8x128xf32>
    %49 = tpu.matmul %47, %1, %cst_19 {dimension_numbers = #tpu.dot_dimension_numbers<[1], [0], [0], [1], [0, 0, 1, 1], [], []>} : vector<8x32xf32>, vector<32x128xf32>, vector<8x128xf32> -> vector<8x128xf32>
    %50 = arith.addf %48, %49 : vector<8x128xf32>
    %51 = arith.negf %50 : vector<8x128xf32>
    %52 = math.exp %51 : vector<8x128xf32>
    %cst_20 = arith.constant 1.000000e+00 : f32
    %53 = vector.broadcast %cst_20 : f32 to vector<8x128xf32>
    %54 = arith.addf %53, %52 : vector<8x128xf32>
    %55 = arith.divf %53, %54 : vector<8x128xf32>
    %56 = math.tanh %50 : vector<8x128xf32>
    %57 = vector.extract_strided_slice %55 {offsets = [0, 0], sizes = [8, 32], strides = [1, 1]} : vector<8x128xf32> to vector<8x32xf32>
    %58 = vector.extract_strided_slice %55 {offsets = [0, 32], sizes = [8, 32], strides = [1, 1]} : vector<8x128xf32> to vector<8x32xf32>
    %59 = vector.extract_strided_slice %55 {offsets = [0, 96], sizes = [8, 32], strides = [1, 1]} : vector<8x128xf32> to vector<8x32xf32>
    %60 = vector.extract_strided_slice %56 {offsets = [0, 64], sizes = [8, 32], strides = [1, 1]} : vector<8x128xf32> to vector<8x32xf32>
    %61 = arith.mulf %58, %45 : vector<8x32xf32>
    %62 = arith.mulf %57, %60 : vector<8x32xf32>
    %63 = arith.addf %61, %62 : vector<8x32xf32>
    %64 = math.tanh %63 : vector<8x32xf32>
    %65 = arith.mulf %59, %64 : vector<8x32xf32>
    %66 = vector.extract_strided_slice %9 {offsets = [24, 0], sizes = [8, 128], strides = [1, 1]} : vector<64x128xf32> to vector<8x128xf32>
    %cst_21 = arith.constant dense<0.000000e+00> : vector<8x128xf32>
    %67 = tpu.matmul %65, %1, %cst_21 {dimension_numbers = #tpu.dot_dimension_numbers<[1], [0], [0], [1], [0, 0, 1, 1], [], []>} : vector<8x32xf32>, vector<32x128xf32>, vector<8x128xf32> -> vector<8x128xf32>
    %68 = arith.addf %66, %67 : vector<8x128xf32>
    %69 = arith.negf %68 : vector<8x128xf32>
    %70 = math.exp %69 : vector<8x128xf32>
    %cst_22 = arith.constant 1.000000e+00 : f32
    %71 = vector.broadcast %cst_22 : f32 to vector<8x128xf32>
    %72 = arith.addf %71, %70 : vector<8x128xf32>
    %73 = arith.divf %71, %72 : vector<8x128xf32>
    %74 = math.tanh %68 : vector<8x128xf32>
    %75 = vector.extract_strided_slice %73 {offsets = [0, 0], sizes = [8, 32], strides = [1, 1]} : vector<8x128xf32> to vector<8x32xf32>
    %76 = vector.extract_strided_slice %73 {offsets = [0, 32], sizes = [8, 32], strides = [1, 1]} : vector<8x128xf32> to vector<8x32xf32>
    %77 = vector.extract_strided_slice %73 {offsets = [0, 96], sizes = [8, 32], strides = [1, 1]} : vector<8x128xf32> to vector<8x32xf32>
    %78 = vector.extract_strided_slice %74 {offsets = [0, 64], sizes = [8, 32], strides = [1, 1]} : vector<8x128xf32> to vector<8x32xf32>
    %79 = arith.mulf %76, %63 : vector<8x32xf32>
    %80 = arith.mulf %75, %78 : vector<8x32xf32>
    %81 = arith.addf %79, %80 : vector<8x32xf32>
    %82 = math.tanh %81 : vector<8x32xf32>
    %83 = arith.mulf %77, %82 : vector<8x32xf32>
    %84 = vector.extract_strided_slice %9 {offsets = [32, 0], sizes = [8, 128], strides = [1, 1]} : vector<64x128xf32> to vector<8x128xf32>
    %cst_23 = arith.constant dense<0.000000e+00> : vector<8x128xf32>
    %85 = tpu.matmul %83, %1, %cst_23 {dimension_numbers = #tpu.dot_dimension_numbers<[1], [0], [0], [1], [0, 0, 1, 1], [], []>} : vector<8x32xf32>, vector<32x128xf32>, vector<8x128xf32> -> vector<8x128xf32>
    %86 = arith.addf %84, %85 : vector<8x128xf32>
    %87 = arith.negf %86 : vector<8x128xf32>
    %88 = math.exp %87 : vector<8x128xf32>
    %cst_24 = arith.constant 1.000000e+00 : f32
    %89 = vector.broadcast %cst_24 : f32 to vector<8x128xf32>
    %90 = arith.addf %89, %88 : vector<8x128xf32>
    %91 = arith.divf %89, %90 : vector<8x128xf32>
    %92 = math.tanh %86 : vector<8x128xf32>
    %93 = vector.extract_strided_slice %91 {offsets = [0, 0], sizes = [8, 32], strides = [1, 1]} : vector<8x128xf32> to vector<8x32xf32>
    %94 = vector.extract_strided_slice %91 {offsets = [0, 32], sizes = [8, 32], strides = [1, 1]} : vector<8x128xf32> to vector<8x32xf32>
    %95 = vector.extract_strided_slice %91 {offsets = [0, 96], sizes = [8, 32], strides = [1, 1]} : vector<8x128xf32> to vector<8x32xf32>
    %96 = vector.extract_strided_slice %92 {offsets = [0, 64], sizes = [8, 32], strides = [1, 1]} : vector<8x128xf32> to vector<8x32xf32>
    %97 = arith.mulf %94, %81 : vector<8x32xf32>
    %98 = arith.mulf %93, %96 : vector<8x32xf32>
    %99 = arith.addf %97, %98 : vector<8x32xf32>
    %100 = math.tanh %99 : vector<8x32xf32>
    %101 = arith.mulf %95, %100 : vector<8x32xf32>
    %102 = vector.extract_strided_slice %9 {offsets = [40, 0], sizes = [8, 128], strides = [1, 1]} : vector<64x128xf32> to vector<8x128xf32>
    %cst_25 = arith.constant dense<0.000000e+00> : vector<8x128xf32>
    %103 = tpu.matmul %101, %1, %cst_25 {dimension_numbers = #tpu.dot_dimension_numbers<[1], [0], [0], [1], [0, 0, 1, 1], [], []>} : vector<8x32xf32>, vector<32x128xf32>, vector<8x128xf32> -> vector<8x128xf32>
    %104 = arith.addf %102, %103 : vector<8x128xf32>
    %105 = arith.negf %104 : vector<8x128xf32>
    %106 = math.exp %105 : vector<8x128xf32>
    %cst_26 = arith.constant 1.000000e+00 : f32
    %107 = vector.broadcast %cst_26 : f32 to vector<8x128xf32>
    %108 = arith.addf %107, %106 : vector<8x128xf32>
    %109 = arith.divf %107, %108 : vector<8x128xf32>
    %110 = math.tanh %104 : vector<8x128xf32>
    %111 = vector.extract_strided_slice %109 {offsets = [0, 0], sizes = [8, 32], strides = [1, 1]} : vector<8x128xf32> to vector<8x32xf32>
    %112 = vector.extract_strided_slice %109 {offsets = [0, 32], sizes = [8, 32], strides = [1, 1]} : vector<8x128xf32> to vector<8x32xf32>
    %113 = vector.extract_strided_slice %109 {offsets = [0, 96], sizes = [8, 32], strides = [1, 1]} : vector<8x128xf32> to vector<8x32xf32>
    %114 = vector.extract_strided_slice %110 {offsets = [0, 64], sizes = [8, 32], strides = [1, 1]} : vector<8x128xf32> to vector<8x32xf32>
    %115 = arith.mulf %112, %99 : vector<8x32xf32>
    %116 = arith.mulf %111, %114 : vector<8x32xf32>
    %117 = arith.addf %115, %116 : vector<8x32xf32>
    %118 = math.tanh %117 : vector<8x32xf32>
    %119 = arith.mulf %113, %118 : vector<8x32xf32>
    %120 = vector.extract_strided_slice %9 {offsets = [48, 0], sizes = [8, 128], strides = [1, 1]} : vector<64x128xf32> to vector<8x128xf32>
    %cst_27 = arith.constant dense<0.000000e+00> : vector<8x128xf32>
    %121 = tpu.matmul %119, %1, %cst_27 {dimension_numbers = #tpu.dot_dimension_numbers<[1], [0], [0], [1], [0, 0, 1, 1], [], []>} : vector<8x32xf32>, vector<32x128xf32>, vector<8x128xf32> -> vector<8x128xf32>
    %122 = arith.addf %120, %121 : vector<8x128xf32>
    %123 = arith.negf %122 : vector<8x128xf32>
    %124 = math.exp %123 : vector<8x128xf32>
    %cst_28 = arith.constant 1.000000e+00 : f32
    %125 = vector.broadcast %cst_28 : f32 to vector<8x128xf32>
    %126 = arith.addf %125, %124 : vector<8x128xf32>
    %127 = arith.divf %125, %126 : vector<8x128xf32>
    %128 = math.tanh %122 : vector<8x128xf32>
    %129 = vector.extract_strided_slice %127 {offsets = [0, 0], sizes = [8, 32], strides = [1, 1]} : vector<8x128xf32> to vector<8x32xf32>
    %130 = vector.extract_strided_slice %127 {offsets = [0, 32], sizes = [8, 32], strides = [1, 1]} : vector<8x128xf32> to vector<8x32xf32>
    %131 = vector.extract_strided_slice %127 {offsets = [0, 96], sizes = [8, 32], strides = [1, 1]} : vector<8x128xf32> to vector<8x32xf32>
    %132 = vector.extract_strided_slice %128 {offsets = [0, 64], sizes = [8, 32], strides = [1, 1]} : vector<8x128xf32> to vector<8x32xf32>
    %133 = arith.mulf %130, %117 : vector<8x32xf32>
    %134 = arith.mulf %129, %132 : vector<8x32xf32>
    %135 = arith.addf %133, %134 : vector<8x32xf32>
    %136 = math.tanh %135 : vector<8x32xf32>
    %137 = arith.mulf %131, %136 : vector<8x32xf32>
    %138 = vector.extract_strided_slice %9 {offsets = [56, 0], sizes = [8, 128], strides = [1, 1]} : vector<64x128xf32> to vector<8x128xf32>
    %cst_29 = arith.constant dense<0.000000e+00> : vector<8x128xf32>
    %139 = tpu.matmul %137, %1, %cst_29 {dimension_numbers = #tpu.dot_dimension_numbers<[1], [0], [0], [1], [0, 0, 1, 1], [], []>} : vector<8x32xf32>, vector<32x128xf32>, vector<8x128xf32> -> vector<8x128xf32>
    %140 = arith.addf %138, %139 : vector<8x128xf32>
    %141 = arith.negf %140 : vector<8x128xf32>
    %142 = math.exp %141 : vector<8x128xf32>
    %cst_30 = arith.constant 1.000000e+00 : f32
    %143 = vector.broadcast %cst_30 : f32 to vector<8x128xf32>
    %144 = arith.addf %143, %142 : vector<8x128xf32>
    %145 = arith.divf %143, %144 : vector<8x128xf32>
    %146 = math.tanh %140 : vector<8x128xf32>
    %147 = vector.extract_strided_slice %145 {offsets = [0, 0], sizes = [8, 32], strides = [1, 1]} : vector<8x128xf32> to vector<8x32xf32>
    %148 = vector.extract_strided_slice %145 {offsets = [0, 32], sizes = [8, 32], strides = [1, 1]} : vector<8x128xf32> to vector<8x32xf32>
    %149 = vector.extract_strided_slice %145 {offsets = [0, 96], sizes = [8, 32], strides = [1, 1]} : vector<8x128xf32> to vector<8x32xf32>
    %150 = vector.extract_strided_slice %146 {offsets = [0, 64], sizes = [8, 32], strides = [1, 1]} : vector<8x128xf32> to vector<8x32xf32>
    %151 = arith.mulf %148, %135 : vector<8x32xf32>
    %152 = arith.mulf %147, %150 : vector<8x32xf32>
    %153 = arith.addf %151, %152 : vector<8x32xf32>
    %154 = math.tanh %153 : vector<8x32xf32>
    %155 = arith.mulf %149, %154 : vector<8x32xf32>
    %cst_31 = arith.constant dense<0.000000e+00> : vector<8x128xf32>
    %156 = tpu.matmul %155, %3, %cst_31 {dimension_numbers = #tpu.dot_dimension_numbers<[1], [0], [0], [1], [0, 0, 1, 1], [], []>} : vector<8x32xf32>, vector<32x128xf32>, vector<8x128xf32> -> vector<8x128xf32>
    %157 = vector.broadcast %5 : vector<1x128xf32> to vector<8x128xf32>
    %158 = arith.addf %156, %157 : vector<8x128xf32>
    %cst_32 = arith.constant 0.000000e+00 : f32
    %159 = vector.broadcast %cst_32 : f32 to vector<1x32xf32>
    %cst_33 = arith.constant 0.000000e+00 : f32
    %160 = vector.broadcast %cst_33 : f32 to vector<1x32xf32>
    %161 = vector.extract_strided_slice %158 {offsets = [0, 0], sizes = [1, 128], strides = [1, 1]} : vector<8x128xf32> to vector<1x128xf32>
    %cst_34 = arith.constant dense<0.000000e+00> : vector<1x128xf32>
    %162 = tpu.matmul %159, %4, %cst_34 {dimension_numbers = #tpu.dot_dimension_numbers<[1], [0], [0], [1], [0, 0, 1, 1], [], []>} : vector<1x32xf32>, vector<32x128xf32>, vector<1x128xf32> -> vector<1x128xf32>
    %163 = arith.addf %161, %162 : vector<1x128xf32>
    %164 = arith.negf %163 : vector<1x128xf32>
    %165 = math.exp %164 : vector<1x128xf32>
    %cst_35 = arith.constant 1.000000e+00 : f32
    %166 = vector.broadcast %cst_35 : f32 to vector<1x128xf32>
    %167 = arith.addf %166, %165 : vector<1x128xf32>
    %168 = arith.divf %166, %167 : vector<1x128xf32>
    %169 = math.tanh %163 : vector<1x128xf32>
    %170 = vector.extract_strided_slice %168 {offsets = [0, 0], sizes = [1, 32], strides = [1, 1]} : vector<1x128xf32> to vector<1x32xf32>
    %171 = vector.extract_strided_slice %168 {offsets = [0, 32], sizes = [1, 32], strides = [1, 1]} : vector<1x128xf32> to vector<1x32xf32>
    %172 = vector.extract_strided_slice %168 {offsets = [0, 96], sizes = [1, 32], strides = [1, 1]} : vector<1x128xf32> to vector<1x32xf32>
    %173 = vector.extract_strided_slice %169 {offsets = [0, 64], sizes = [1, 32], strides = [1, 1]} : vector<1x128xf32> to vector<1x32xf32>
    %174 = arith.mulf %171, %160 : vector<1x32xf32>
    %175 = arith.mulf %170, %173 : vector<1x32xf32>
    %176 = arith.addf %174, %175 : vector<1x32xf32>
    %177 = math.tanh %176 : vector<1x32xf32>
    %178 = arith.mulf %172, %177 : vector<1x32xf32>
    %179 = vector.extract_strided_slice %158 {offsets = [1, 0], sizes = [1, 128], strides = [1, 1]} : vector<8x128xf32> to vector<1x128xf32>
    %cst_36 = arith.constant dense<0.000000e+00> : vector<1x128xf32>
    %180 = tpu.matmul %178, %4, %cst_36 {dimension_numbers = #tpu.dot_dimension_numbers<[1], [0], [0], [1], [0, 0, 1, 1], [], []>} : vector<1x32xf32>, vector<32x128xf32>, vector<1x128xf32> -> vector<1x128xf32>
    %181 = arith.addf %179, %180 : vector<1x128xf32>
    %182 = arith.negf %181 : vector<1x128xf32>
    %183 = math.exp %182 : vector<1x128xf32>
    %cst_37 = arith.constant 1.000000e+00 : f32
    %184 = vector.broadcast %cst_37 : f32 to vector<1x128xf32>
    %185 = arith.addf %184, %183 : vector<1x128xf32>
    %186 = arith.divf %184, %185 : vector<1x128xf32>
    %187 = math.tanh %181 : vector<1x128xf32>
    %188 = vector.extract_strided_slice %186 {offsets = [0, 0], sizes = [1, 32], strides = [1, 1]} : vector<1x128xf32> to vector<1x32xf32>
    %189 = vector.extract_strided_slice %186 {offsets = [0, 32], sizes = [1, 32], strides = [1, 1]} : vector<1x128xf32> to vector<1x32xf32>
    %190 = vector.extract_strided_slice %186 {offsets = [0, 96], sizes = [1, 32], strides = [1, 1]} : vector<1x128xf32> to vector<1x32xf32>
    %191 = vector.extract_strided_slice %187 {offsets = [0, 64], sizes = [1, 32], strides = [1, 1]} : vector<1x128xf32> to vector<1x32xf32>
    %192 = arith.mulf %189, %176 : vector<1x32xf32>
    %193 = arith.mulf %188, %191 : vector<1x32xf32>
    %194 = arith.addf %192, %193 : vector<1x32xf32>
    %195 = math.tanh %194 : vector<1x32xf32>
    %196 = arith.mulf %190, %195 : vector<1x32xf32>
    %197 = vector.extract_strided_slice %158 {offsets = [2, 0], sizes = [1, 128], strides = [1, 1]} : vector<8x128xf32> to vector<1x128xf32>
    %cst_38 = arith.constant dense<0.000000e+00> : vector<1x128xf32>
    %198 = tpu.matmul %196, %4, %cst_38 {dimension_numbers = #tpu.dot_dimension_numbers<[1], [0], [0], [1], [0, 0, 1, 1], [], []>} : vector<1x32xf32>, vector<32x128xf32>, vector<1x128xf32> -> vector<1x128xf32>
    %199 = arith.addf %197, %198 : vector<1x128xf32>
    %200 = arith.negf %199 : vector<1x128xf32>
    %201 = math.exp %200 : vector<1x128xf32>
    %cst_39 = arith.constant 1.000000e+00 : f32
    %202 = vector.broadcast %cst_39 : f32 to vector<1x128xf32>
    %203 = arith.addf %202, %201 : vector<1x128xf32>
    %204 = arith.divf %202, %203 : vector<1x128xf32>
    %205 = math.tanh %199 : vector<1x128xf32>
    %206 = vector.extract_strided_slice %204 {offsets = [0, 0], sizes = [1, 32], strides = [1, 1]} : vector<1x128xf32> to vector<1x32xf32>
    %207 = vector.extract_strided_slice %204 {offsets = [0, 32], sizes = [1, 32], strides = [1, 1]} : vector<1x128xf32> to vector<1x32xf32>
    %208 = vector.extract_strided_slice %204 {offsets = [0, 96], sizes = [1, 32], strides = [1, 1]} : vector<1x128xf32> to vector<1x32xf32>
    %209 = vector.extract_strided_slice %205 {offsets = [0, 64], sizes = [1, 32], strides = [1, 1]} : vector<1x128xf32> to vector<1x32xf32>
    %210 = arith.mulf %207, %194 : vector<1x32xf32>
    %211 = arith.mulf %206, %209 : vector<1x32xf32>
    %212 = arith.addf %210, %211 : vector<1x32xf32>
    %213 = math.tanh %212 : vector<1x32xf32>
    %214 = arith.mulf %208, %213 : vector<1x32xf32>
    %215 = vector.extract_strided_slice %158 {offsets = [3, 0], sizes = [1, 128], strides = [1, 1]} : vector<8x128xf32> to vector<1x128xf32>
    %cst_40 = arith.constant dense<0.000000e+00> : vector<1x128xf32>
    %216 = tpu.matmul %214, %4, %cst_40 {dimension_numbers = #tpu.dot_dimension_numbers<[1], [0], [0], [1], [0, 0, 1, 1], [], []>} : vector<1x32xf32>, vector<32x128xf32>, vector<1x128xf32> -> vector<1x128xf32>
    %217 = arith.addf %215, %216 : vector<1x128xf32>
    %218 = arith.negf %217 : vector<1x128xf32>
    %219 = math.exp %218 : vector<1x128xf32>
    %cst_41 = arith.constant 1.000000e+00 : f32
    %220 = vector.broadcast %cst_41 : f32 to vector<1x128xf32>
    %221 = arith.addf %220, %219 : vector<1x128xf32>
    %222 = arith.divf %220, %221 : vector<1x128xf32>
    %223 = math.tanh %217 : vector<1x128xf32>
    %224 = vector.extract_strided_slice %222 {offsets = [0, 0], sizes = [1, 32], strides = [1, 1]} : vector<1x128xf32> to vector<1x32xf32>
    %225 = vector.extract_strided_slice %222 {offsets = [0, 32], sizes = [1, 32], strides = [1, 1]} : vector<1x128xf32> to vector<1x32xf32>
    %226 = vector.extract_strided_slice %222 {offsets = [0, 96], sizes = [1, 32], strides = [1, 1]} : vector<1x128xf32> to vector<1x32xf32>
    %227 = vector.extract_strided_slice %223 {offsets = [0, 64], sizes = [1, 32], strides = [1, 1]} : vector<1x128xf32> to vector<1x32xf32>
    %228 = arith.mulf %225, %212 : vector<1x32xf32>
    %229 = arith.mulf %224, %227 : vector<1x32xf32>
    %230 = arith.addf %228, %229 : vector<1x32xf32>
    %231 = math.tanh %230 : vector<1x32xf32>
    %232 = arith.mulf %226, %231 : vector<1x32xf32>
    %c0_42 = arith.constant 0 : index
    %c0_43 = arith.constant 0 : index
    %233 = vector.load %arg8[%c0_42, %c0_43] : memref<32x4xf32, #tpu.memory_space<vmem>>, vector<32x4xf32>
    %cst_44 = arith.constant dense<0.000000e+00> : vector<1x4xf32>
    %234 = tpu.matmul %232, %233, %cst_44 {dimension_numbers = #tpu.dot_dimension_numbers<[1], [0], [0], [1], [0, 0, 1, 1], [], []>} : vector<1x32xf32>, vector<32x4xf32>, vector<1x4xf32> -> vector<1x4xf32>
    %c0_45 = arith.constant 0 : index
    %c0_46 = arith.constant 0 : index
    %235 = vector.load %arg9[%c0_45, %c0_46] : memref<1x4xf32, #tpu.memory_space<vmem>>, vector<1x4xf32>
    %236 = arith.addf %234, %235 : vector<1x4xf32>
    %c0_47 = arith.constant 0 : index
    %c0_48 = arith.constant 0 : index
    %237 = vector.load %arg7[%c0_47, %c0_48] : memref<128x4xf32, #tpu.memory_space<vmem>>, vector<128x4xf32>
    %238 = vector.extract_strided_slice %155 {offsets = [0, 0], sizes = [1, 32], strides = [1, 1]} : vector<8x32xf32> to vector<1x32xf32>
    %239 = vector.extract_strided_slice %237 {offsets = [0, 0], sizes = [32, 4], strides = [1, 1]} : vector<128x4xf32> to vector<32x4xf32>
    %cst_49 = arith.constant dense<0.000000e+00> : vector<1x4xf32>
    %240 = tpu.matmul %238, %239, %cst_49 {dimension_numbers = #tpu.dot_dimension_numbers<[1], [0], [0], [1], [0, 0, 1, 1], [], []>} : vector<1x32xf32>, vector<32x4xf32>, vector<1x4xf32> -> vector<1x4xf32>
    %241 = arith.addf %236, %240 : vector<1x4xf32>
    %242 = vector.extract_strided_slice %155 {offsets = [1, 0], sizes = [1, 32], strides = [1, 1]} : vector<8x32xf32> to vector<1x32xf32>
    %243 = vector.extract_strided_slice %237 {offsets = [32, 0], sizes = [32, 4], strides = [1, 1]} : vector<128x4xf32> to vector<32x4xf32>
    %cst_50 = arith.constant dense<0.000000e+00> : vector<1x4xf32>
    %244 = tpu.matmul %242, %243, %cst_50 {dimension_numbers = #tpu.dot_dimension_numbers<[1], [0], [0], [1], [0, 0, 1, 1], [], []>} : vector<1x32xf32>, vector<32x4xf32>, vector<1x4xf32> -> vector<1x4xf32>
    %245 = arith.addf %241, %244 : vector<1x4xf32>
    %246 = vector.extract_strided_slice %155 {offsets = [2, 0], sizes = [1, 32], strides = [1, 1]} : vector<8x32xf32> to vector<1x32xf32>
    %247 = vector.extract_strided_slice %237 {offsets = [64, 0], sizes = [32, 4], strides = [1, 1]} : vector<128x4xf32> to vector<32x4xf32>
    %cst_51 = arith.constant dense<0.000000e+00> : vector<1x4xf32>
    %248 = tpu.matmul %246, %247, %cst_51 {dimension_numbers = #tpu.dot_dimension_numbers<[1], [0], [0], [1], [0, 0, 1, 1], [], []>} : vector<1x32xf32>, vector<32x4xf32>, vector<1x4xf32> -> vector<1x4xf32>
    %249 = arith.addf %245, %248 : vector<1x4xf32>
    %250 = vector.extract_strided_slice %155 {offsets = [3, 0], sizes = [1, 32], strides = [1, 1]} : vector<8x32xf32> to vector<1x32xf32>
    %251 = vector.extract_strided_slice %237 {offsets = [96, 0], sizes = [32, 4], strides = [1, 1]} : vector<128x4xf32> to vector<32x4xf32>
    %cst_52 = arith.constant dense<0.000000e+00> : vector<1x4xf32>
    %252 = tpu.matmul %250, %251, %cst_52 {dimension_numbers = #tpu.dot_dimension_numbers<[1], [0], [0], [1], [0, 0, 1, 1], [], []>} : vector<1x32xf32>, vector<32x4xf32>, vector<1x4xf32> -> vector<1x4xf32>
    %253 = arith.addf %249, %252 : vector<1x4xf32>
    %c0_53 = arith.constant 0 : index
    %c0_54 = arith.constant 0 : index
    %254 = vector.load %arg10[%c0_53, %c0_54] : memref<1x4xf32, #tpu.memory_space<vmem>>, vector<1x4xf32>
    tpu.vector_store %arg10[%c0_53, %c0_54], %253 {strides = array<i32>} : memref<1x4xf32, #tpu.memory_space<vmem>>, vector<1x4xf32>,
    return
  }
}

</mosaic_0001>

<bundles_post_ra>
// kernel: two_level_lstm_forward.1
= control target key start
LH: loop header
LB: loop body
LE: loop exit
PB: predicated region body
PF: predicated region fallthrough
CT: control target
= control target key end

     0   :  { %v2385_v3 = vmov 0.0   ;;  %vm68_vm0 = vcmask 261120   ;;  %s2879_s0 = inlined_call_operand.vmem [shape: f32[64,32], index: 0, kind: input, shape index: {}]   ;;  %s2880_s1 = inlined_call_operand.vmem [shape: f32[32,128], index: 1, kind: input, shape index: {}]   ;;  %s2881_s2 = inlined_call_operand.vmem [shape: f32[32,128], index: 2, kind: input, shape index: {}]   ;;  %s2882_s3 = inlined_call_operand.vmem [shape: f32[1,128], index: 3, kind: input, shape index: {}]   ;;  %s2883_s4 = inlined_call_operand.vmem [shape: f32[32,128], index: 4, kind: input, shape index: {}]   ;;  %s2884_s5 = inlined_call_operand.vmem [shape: f32[32,128], index: 5, kind: input, shape index: {}]   ;;  %s2885_s6 = inlined_call_operand.vmem [shape: f32[1,128], index: 6, kind: input, shape index: {}]   ;;  %s2886_s7 = inlined_call_operand.vmem [shape: f32[128,4], index: 7, kind: input, shape index: {}]   ;;  %s2887_s8 = inlined_call_operand.vmem [shape: f32[32,4], index: 8, kind: input, shape index: {}]   ;;  %s2888_s9 = inlined_call_operand.vmem [shape: f32[1,4], index: 9, kind: input, shape index: {}]   ;;  %s2889_s10 = inlined_call_operand.hbm [shape: f32[1,4], index: 10, kind: output, shape index: {}]  }
   0x1   :  { %v39_v0 = vld [vmem:[%s2880_s1 + $0x18] sm:$0xff]  ;;  %v38_v1 = vld [vmem:[%s2880_s1 + $0x10] sm:$0xff]  ;;  %2064 = vmatprep.subr.mxu1 %v2385_v3  ;;  %v37_v5 = vld [vmem:[%s2880_s1 + $0x8] sm:$0xff] }
   0x2   :  { %v2454_v2 = vld [vmem:[%s2881_s2 + $0x18] sm:$0xff]  ;;  %2044 = vmatprep.subr.mxu0 %v39_v0  ;;  %v2460_v4 = vld [vmem:[%s2881_s2 + $0x10] sm:$0xff]  ;;  %v54_v6 = vld [vmem:[%s2879_s0] sm:$0xff] }
   0x3   :  { %2045 = vmatpush3.msra.mxu0 %v39_v0  ;;  %2065 = vmatpush3.msra.mxu1 %v2454_v2 }
   0x4   :  { %2046 = vmatprep.subr.mxu0 %v38_v1  ;;  %2066 = vmatprep.subr.mxu1 %v2385_v3 }
   0x5   :  { %15 = vsyncpa [#allocation3], 0  ;;  %2047 = vmatpush3.msra.mxu0 %v38_v1  ;;  %2067 = vmatpush3.msra.mxu1 %v2460_v4  ;;  %v36_v7 = vld [vmem:[%s2880_s1] sm:$0xff]  ;;  %v2477_v8 = vld [vmem:[%s2881_s2 + $0x8] sm:$0xff]  ;;  %vm2386_vm1 = vmmov 0   ;;  %s2387_s13 = smov 64  }
   0x6   :  { %2048 = vmatprep.subr.mxu0 %v37_v5  ;;  %2068 = vmatprep.subr.mxu1 %v2385_v3  ;;  %v55_v9 = vld [vmem:[%s2879_s0 + $0x8] sm:$0xff]  ;;  %v2487_v10 = vld [vmem:[%s2881_s2] sm:$0xff]  ;;  %v56_v46 = vld [vmem:[%s2879_s0 + $0x10] sm:$0xff]  ;;  %vm1888_vm2 = vcmask 24576  }
   0x7   :  { %2049 = vmatpush3.msra.mxu0 %v37_v5  ;;  %2052 = vmatprep.mubr.msk.f32.mxu0 %vm68_vm0, %v54_v6  ;;  %v2519_v12 = vld [vmem:[%s2882_s3] ss:$0 sm:$0xff]  ;;  %s2388_s3 = smov 32   ;;  %v57_v47 = vld [vmem:[%s2879_s0 + $0x18] sm:$0xff]  ;;  %v59_v49 = vld [vmem:[%s2879_s0 + $0x28] sm:$0xff] }
   0x8   :  { %2050 = vmatprep.subr.mxu0 %v36_v7  ;;  %2069 = vmatpush3.msra.mxu1 %v2477_v8  ;;  %v58_v48 = vld [vmem:[%s2879_s0 + $0x20] sm:$0xff]  ;;  %v60_v50 = vld [vmem:[%s2879_s0 + $0x30] sm:$0xff]  ;;  %v61_v51 = vld [vmem:[%s2879_s0 + $0x38] sm:$0xff] }
   0x9   :  { %2051 = vmatpush3.msra.mxu0 %v36_v7  ;;  %2070 = vmatprep.subr.mxu1 %v2385_v3 }
   0xa   :  { %2053 = vmatmul.mubr.msk.f32.vlgmr.msra.gmra.mxu0 %vm68_vm0, %v55_v9  ;;  %2071 = vmatpush3.msra.mxu1 %v2487_v10 }
   0xb   :  { %2072 = vmatprep.mubr.msk.f32.mxu1 %vm2386_vm1, %v2385_v3  ;;  %2075 = vmatprep.subr.mxu1 %v2385_v3 }
   0xc   :  { %2073 = vmatmul.mubr.f32.vlgmr.msra.gmra.mxu1 %v2385_v3  ;;  %2086 = vmatprep.subr.mxu0 %v2385_v3 }
   0xd   :  { %2076 = vmatpush3.msra.mxu1 %v2454_v2  ;;  %2083 = vmatprep.mubr.msk.f32.mxu1 %vm2386_vm1, %v2385_v3 }
   0xe   :  { %2077 = vmatprep.subr.mxu1 %v2385_v3  ;;  %2087 = vmatpush3.msra.mxu0 %v2454_v2 }
   0xf   :  { %2078 = vmatpush3.msra.mxu1 %v2460_v4  ;;  %2088 = vmatprep.subr.mxu0 %v2385_v3 }
  0x10   :  { %2079 = vmatprep.subr.mxu1 %v2385_v3  ;;  %2089 = vmatpush3.msra.mxu0 %v2460_v4 }
  0x11   :  { %2080 = vmatpush3.msra.mxu1 %v2477_v8  ;;  %2090 = vmatprep.subr.mxu0 %v2385_v3 }
  0x12   :  { %2081 = vmatprep.subr.mxu1 %v2385_v3  ;;  %2091 = vmatpush3.msra.mxu0 %v2477_v8 }
  0x13   :  { %2082 = vmatpush3.msra.mxu1 %v2487_v10  ;;  %2092 = vmatprep.subr.mxu0 %v2385_v3 }
  0x14   :  { %2093 = vmatpush3.msra.mxu0 %v2487_v10  ;;  %2097 = vmatprep.subr.mxu1 %v2385_v3 }
  0x15   :  { %2108 = vmatprep.subr.mxu0 %v2385_v3  ;;  %2055 = vmatprep.mubr.msk.f32.mxu0 %vm68_vm0, %v56_v46 }
  0x16   :  { %2056 = vmatmul.mubr.msk.f32.gmra.mxu0 %vm68_vm0, %v57_v47 }
  0x17   :  { %2058 = vmatprep.mubr.msk.f32.mxu0 %vm68_vm0, %v58_v48 }
  0x1a   :  { %2059 = vmatmul.mubr.msk.f32.gmra.mxu0 %vm68_vm0, %v59_v49 }
  0x1b   :  { %2061 = vmatprep.mubr.msk.f32.mxu0 %vm68_vm0, %v60_v50 }
  0x1e   :  { %2062 = vmatmul.mubr.msk.f32.gmra.mxu0 %vm68_vm0, %v61_v51 }
  0x1f   :  { %2094 = vmatprep.mubr.msk.f32.mxu0 %vm2386_vm1, %v2385_v3 }
  0xca   :  { %v2054_v11 = vpop.f32.mrf.mxu0 }
  0xcb   :  { %v165_v32 = vadd.f32 %v2054_v11, %v2519_v12 }
  0xcc   :  { %v159_v13 = vpop.f32.mrf.mxu0  ;;  %v267_v14 = vpop.f32.mrf.mxu1 }
  0xcd   :  { %v160_v15 = vadd.f32 %v2519_v12, %v159_v13 }
  0xce   :  { %v2074_v16 = vpop.f32.mrf.mxu1 }
  0xcf   :  { %v271_v17 = vadd.f32 %v267_v14, %v160_v15 }
  0xd1   :  { %2267 = vtanh.f32 %v271_v17  ;;  %v1913_v19 = vmul.f32 -1.442695, %v271_v17 }
  0xd3   :  { %2269 = vpow2.f32 %v1913_v19 }
  0xd6   :  { %v2057_v56 = vpop.f32.mrf.mxu0 }
  0xd8   :  { %v169_v57 = vpop.f32.mrf.mxu0 }
  0xd9   :  { %v170_v62 = vadd.f32 %v2519_v12, %v169_v57 }
  0xda   :  { %v2579_v58 = vpop.f32.mrf.mxu0 }
  0xdc   :  { %v2581_v59 = vpop.f32.mrf.mxu0 }
  0xde   :  { %v2268_v18 = vpop.eup %2267  ;;  %v2583_v60 = vpop.f32.mrf.mxu0 }
  0xdf   :  { %281 = vrot.lane.b32.xlu0 %v2268_v18, %s2387_s13 }
  0xe0   :  { %v2270_v20 = vpop.eup %2269  ;;  %v2585_v61 = vpop.f32.mrf.mxu0 }
  0xe1   :  { %v275_v21 = vadd.f32 1.0, %v2270_v20 }
  0xe3   :  { %2271 = vrcp.f32 %v275_v21 }
  0xf0   :  { %v2272_v22 = vpop.eup %2271 }
  0xf1   :  { %v279_v25 = vmul.f32 0.0, %v2272_v22 }
 0x151   :  { %v282_v23 = vpop.permute.xlu0 %281 }
 0x152   :  { %v284_v24 = vmul.f32 %v2272_v22, %v282_v23 }
 0x154   :  { %286 = vrot.lane.b32.xlu0 %v284_v24, %s2388_s3 }
 0x1c6   :  { %v287_v26 = vpop.permute.xlu0 %286 }
 0x1c7   :  { %v289_v27 = vadd.f32 %v287_v26, %v279_v25 }
 0x1c9   :  { %2273 = vtanh.f32 %v289_v27 }
 0x1d6   :  { %v2274_v28 = vpop.eup %2273 }
 0x1d7   :  { %292 = vrot.lane.b32.xlu1 %v2274_v28, %s2387_s13 }
 0x249   :  { %v293_v29 = vpop.permute.xlu1 %292 }
 0x24a   :  { %v295_v30 = vmul.f32 %v2272_v22, %v293_v29  ;;  %v175_v22 = vadd.f32 %v2057_v56, %v2519_v12 }
 0x24c   :  { %297 = vrot.lane.b32.xlu1 %v295_v30, %s2388_s3 }
 0x2be   :  { %v298_v31 = vpop.permute.xlu1 %297 }
 0x2bf   :  { %2084 = vmatmul.mubr.msk.f32.vlgmr.msra.gmra.mxu1 %vm68_vm0, %v298_v31 }
 0x2c0   :  { %2098 = vmatpush3.msra.mxu1 %v2454_v2  ;;  %2105 = vmatprep.mubr.msk.f32.mxu1 %vm2386_vm1, %v2385_v3 }
 0x2c1   :  { %2099 = vmatprep.subr.mxu1 %v2385_v3 }
 0x2c2   :  { %2100 = vmatpush3.msra.mxu1 %v2460_v4 }
 0x2c3   :  { %2101 = vmatprep.subr.mxu1 %v2385_v3 }
 0x2c4   :  { %2102 = vmatpush3.msra.mxu1 %v2477_v8 }
 0x2c5   :  { %2103 = vmatprep.subr.mxu1 %v2385_v3 }
 0x2c6   :  { %2104 = vmatpush3.msra.mxu1 %v2487_v10 }
 0x2c7   :  { %2119 = vmatprep.subr.mxu1 %v2385_v3 }
 0x37f   :  { %v367_v33 = vpop.f32.mrf.mxu1 }
 0x380   :  { %v371_v34 = vadd.f32 %v367_v33, %v165_v32 }
 0x381   :  { %v2085_v35 = vpop.f32.mrf.mxu1 }
 0x382   :  { %2275 = vtanh.f32 %v371_v34  ;;  %v1915_v37 = vmul.f32 -1.442695, %v371_v34 }
 0x384   :  { %2277 = vpow2.f32 %v1915_v37 }
 0x38f   :  { %v2276_v36 = vpop.eup %2275 }
 0x390   :  { %381 = vrot.lane.b32.xlu0 %v2276_v36, %s2387_s13 }
 0x391   :  { %v2278_v38 = vpop.eup %2277 }
 0x392   :  { %v375_v39 = vadd.f32 1.0, %v2278_v38 }
 0x394   :  { %2279 = vrcp.f32 %v375_v39 }
 0x3a1   :  { %v2280_v40 = vpop.eup %2279 }
 0x3a2   :  { %v379_v43 = vmul.f32 %v2280_v40, %v289_v27 }
 0x402   :  { %v382_v41 = vpop.permute.xlu0 %381 }
 0x403   :  { %v384_v42 = vmul.f32 %v2280_v40, %v382_v41 }
 0x405   :  { %386 = vrot.lane.b32.xlu1 %v384_v42, %s2388_s3 }
 0x477   :  { %v387_v44 = vpop.permute.xlu1 %386 }
 0x478   :  { %v389_v45 = vadd.f32 %v387_v44, %v379_v43 }
 0x47a   :  { %2281 = vtanh.f32 %v389_v45 }
 0x487   :  { %v2282_v52 = vpop.eup %2281 }
 0x488   :  { %392 = vrot.lane.b32.xlu0 %v2282_v52, %s2387_s13 }
 0x4fa   :  { %v393_v53 = vpop.permute.xlu0 %392 }
 0x4fb   :  { %v395_v54 = vmul.f32 %v2280_v40, %v393_v53  ;;  %v180_v40 = vadd.f32 %v2519_v12, %v2581_v59 }
 0x4fd   :  { %397 = vrot.lane.b32.xlu1 %v395_v54, %s2388_s3 }
 0x56f   :  { %v398_v55 = vpop.permute.xlu1 %397 }
 0x570   :  { %2095 = vmatmul.mubr.msk.f32.vlgmr.msra.gmra.mxu0 %vm68_vm0, %v398_v55 }
 0x571   :  { %2109 = vmatpush3.msra.mxu0 %v2454_v2  ;;  %2116 = vmatprep.mubr.msk.f32.mxu0 %vm2386_vm1, %v2385_v3 }
 0x572   :  { %2110 = vmatprep.subr.mxu0 %v2385_v3 }
 0x573   :  { %2111 = vmatpush3.msra.mxu0 %v2460_v4 }
 0x574   :  { %2112 = vmatprep.subr.mxu0 %v2385_v3 }
 0x575   :  { %2113 = vmatpush3.msra.mxu0 %v2477_v8 }
 0x576   :  { %2114 = vmatprep.subr.mxu0 %v2385_v3 }
 0x577   :  { %2115 = vmatpush3.msra.mxu0 %v2487_v10 }
 0x578   :  { %2130 = vmatprep.subr.mxu0 %v2385_v3 }
 0x630   :  { %v467_v63 = vpop.f32.mrf.mxu0 }
 0x631   :  { %v471_v0 = vadd.f32 %v467_v63, %v170_v62 }
 0x632   :  { %v2096_v1 = vpop.f32.mrf.mxu0 }
 0x633   :  { %2283 = vtanh.f32 %v471_v0  ;;  %v1917_v6 = vmul.f32 -1.442695, %v471_v0 }
 0x635   :  { %2285 = vpow2.f32 %v1917_v6 }
 0x640   :  { %v2284_v5 = vpop.eup %2283 }
 0x641   :  { %481 = vrot.lane.b32.xlu0 %v2284_v5, %s2387_s13 }
 0x642   :  { %v2286_v7 = vpop.eup %2285 }
 0x643   :  { %v475_v9 = vadd.f32 1.0, %v2286_v7 }
 0x645   :  { %2287 = vrcp.f32 %v475_v9 }
 0x652   :  { %v2288_v11 = vpop.eup %2287 }
 0x653   :  { %v479_v15 = vmul.f32 %v2288_v11, %v389_v45 }
 0x6b3   :  { %v482_v13 = vpop.permute.xlu0 %481 }
 0x6b4   :  { %v484_v14 = vmul.f32 %v2288_v11, %v482_v13 }
 0x6b6   :  { %486 = vrot.lane.b32.xlu1 %v484_v14, %s2388_s3 }
 0x728   :  { %v487_v16 = vpop.permute.xlu1 %486 }
 0x729   :  { %v489_v17 = vadd.f32 %v487_v16, %v479_v15  ;;  %v190_v16 = vadd.f32 %v2519_v12, %v2585_v61 }
 0x72b   :  { %2289 = vtanh.f32 %v489_v17 }
 0x738   :  { %v2290_v18 = vpop.eup %2289 }
 0x739   :  { %492 = vrot.lane.b32.xlu0 %v2290_v18, %s2387_s13 }
 0x7ab   :  { %v493_v19 = vpop.permute.xlu0 %492 }
 0x7ac   :  { %v495_v20 = vmul.f32 %v2288_v11, %v493_v19 }
 0x7ae   :  { %497 = vrot.lane.b32.xlu1 %v495_v20, %s2388_s3 }
 0x820   :  { %v498_v21 = vpop.permute.xlu1 %497 }
 0x821   :  { %2106 = vmatmul.mubr.msk.f32.vlgmr.msra.gmra.mxu1 %vm68_vm0, %v498_v21 }
 0x822   :  { %2120 = vmatpush3.msra.mxu1 %v2454_v2  ;;  %2127 = vmatprep.mubr.msk.f32.mxu1 %vm2386_vm1, %v2385_v3 }
 0x823   :  { %2121 = vmatprep.subr.mxu1 %v2385_v3 }
 0x824   :  { %2122 = vmatpush3.msra.mxu1 %v2460_v4 }
 0x825   :  { %2123 = vmatprep.subr.mxu1 %v2385_v3 }
 0x826   :  { %2124 = vmatpush3.msra.mxu1 %v2477_v8 }
 0x827   :  { %2125 = vmatprep.subr.mxu1 %v2385_v3 }
 0x828   :  { %2126 = vmatpush3.msra.mxu1 %v2487_v10 }
 0x829   :  { %2141 = vmatprep.subr.mxu1 %v2385_v3 }
 0x8e1   :  { %v567_v23 = vpop.f32.mrf.mxu1 }
 0x8e2   :  { %v571_v24 = vadd.f32 %v567_v23, %v175_v22 }
 0x8e3   :  { %v2107_v25 = vpop.f32.mrf.mxu1 }
 0x8e4   :  { %2291 = vtanh.f32 %v571_v24  ;;  %v1919_v27 = vmul.f32 -1.442695, %v571_v24 }
 0x8e6   :  { %2293 = vpow2.f32 %v1919_v27 }
 0x8f1   :  { %v2292_v26 = vpop.eup %2291 }
 0x8f2   :  { %581 = vrot.lane.b32.xlu0 %v2292_v26, %s2387_s13 }
 0x8f3   :  { %v2294_v28 = vpop.eup %2293 }
 0x8f4   :  { %v575_v29 = vadd.f32 1.0, %v2294_v28 }
 0x8f6   :  { %2295 = vrcp.f32 %v575_v29 }
 0x903   :  { %v2296_v30 = vpop.eup %2295 }
 0x904   :  { %v579_v33 = vmul.f32 %v2296_v30, %v489_v17 }
 0x964   :  { %v582_v31 = vpop.permute.xlu0 %581 }
 0x965   :  { %v584_v32 = vmul.f32 %v2296_v30, %v582_v31 }
 0x967   :  { %586 = vrot.lane.b32.xlu1 %v584_v32, %s2388_s3 }
 0x9d9   :  { %v587_v34 = vpop.permute.xlu1 %586 }
 0x9da   :  { %v589_v35 = vadd.f32 %v587_v34, %v579_v33  ;;  %v195_v33 = vadd.f32 %v2583_v60, %v2519_v12  ;;  %v48_v60 = vld [vmem:[%s2883_s4 + $0x18] sm:$0xff] }
 0x9dc   :  { %2297 = vtanh.f32 %v589_v35 }
 0x9e9   :  { %v2298_v36 = vpop.eup %2297 }
 0x9ea   :  { %592 = vrot.lane.b32.xlu0 %v2298_v36, %s2387_s13 }
 0xa5c   :  { %v593_v37 = vpop.permute.xlu0 %592 }
 0xa5d   :  { %v595_v38 = vmul.f32 %v2296_v30, %v593_v37 }
 0xa5f   :  { %597 = vrot.lane.b32.xlu1 %v595_v38, %s2388_s3 }
 0xad1   :  { %v598_v39 = vpop.permute.xlu1 %597 }
 0xad2   :  { %2117 = vmatmul.mubr.msk.f32.vlgmr.msra.gmra.mxu0 %vm68_vm0, %v598_v39 }
 0xad3   :  { %2131 = vmatpush3.msra.mxu0 %v2454_v2  ;;  %2138 = vmatprep.mubr.msk.f32.mxu0 %vm2386_vm1, %v2385_v3 }
 0xad4   :  { %2132 = vmatprep.subr.mxu0 %v2385_v3 }
 0xad5   :  { %2133 = vmatpush3.msra.mxu0 %v2460_v4 }
 0xad6   :  { %2134 = vmatprep.subr.mxu0 %v2385_v3 }
 0xad7   :  { %2135 = vmatpush3.msra.mxu0 %v2477_v8 }
 0xad8   :  { %2136 = vmatprep.subr.mxu0 %v2385_v3 }
 0xad9   :  { %2137 = vmatpush3.msra.mxu0 %v2487_v10 }
 0xada   :  { %2152 = vmatprep.subr.mxu0 %v2385_v3 }
 0xb92   :  { %v667_v41 = vpop.f32.mrf.mxu0 }
 0xb93   :  { %v671_v42 = vadd.f32 %v667_v41, %v180_v40 }
 0xb94   :  { %v2118_v43 = vpop.f32.mrf.mxu0 }
 0xb95   :  { %2299 = vtanh.f32 %v671_v42  ;;  %v1921_v45 = vmul.f32 -1.442695, %v671_v42 }
 0xb97   :  { %2301 = vpow2.f32 %v1921_v45 }
 0xba2   :  { %v2300_v44 = vpop.eup %2299 }
 0xba3   :  { %681 = vrot.lane.b32.xlu0 %v2300_v44, %s2387_s13 }
 0xba4   :  { %v2302_v46 = vpop.eup %2301 }
 0xba5   :  { %v675_v47 = vadd.f32 1.0, %v2302_v46  ;;  %v2664_v46 = vld [vmem:[%s2884_s5 + $0x18] sm:$0xff] }
 0xba7   :  { %2303 = vrcp.f32 %v675_v47  ;;  %v47_v47 = vld [vmem:[%s2883_s4 + $0x10] sm:$0xff] }
 0xbb4   :  { %v2304_v48 = vpop.eup %2303 }
 0xbb5   :  { %v679_v51 = vmul.f32 %v2304_v48, %v589_v35 }
 0xc15   :  { %v682_v49 = vpop.permute.xlu0 %681 }
 0xc16   :  { %v684_v50 = vmul.f32 %v2304_v48, %v682_v49  ;;  %v46_v49 = vld [vmem:[%s2883_s4 + $0x8] sm:$0xff] }
 0xc18   :  { %686 = vrot.lane.b32.xlu1 %v684_v50, %s2388_s3  ;;  %v2683_v50 = vld [vmem:[%s2884_s5 + $0x8] sm:$0xff] }
 0xc8a   :  { %v687_v52 = vpop.permute.xlu1 %686 }
 0xc8b   :  { %v689_v53 = vadd.f32 %v687_v52, %v679_v51  ;;  %v45_v51 = vld [vmem:[%s2883_s4] sm:$0xff] }
 0xc8c   :  { %v2694_v52 = vld [vmem:[%s2884_s5] sm:$0xff] }
 0xc8d   :  { %2305 = vtanh.f32 %v689_v53 }
 0xc9a   :  { %v2306_v54 = vpop.eup %2305 }
 0xc9b   :  { %692 = vrot.lane.b32.xlu0 %v2306_v54, %s2387_s13 }
 0xd0d   :  { %v693_v55 = vpop.permute.xlu0 %692 }
 0xd0e   :  { %v695_v56 = vmul.f32 %v2304_v48, %v693_v55  ;;  %v2673_v48 = vld [vmem:[%s2884_s5 + $0x10] sm:$0xff] }
 0xd10   :  { %697 = vrot.lane.b32.xlu1 %v695_v56, %s2388_s3 }
 0xd82   :  { %v698_v57 = vpop.permute.xlu1 %697 }
 0xd83   :  { %2128 = vmatmul.mubr.msk.f32.vlgmr.msra.gmra.mxu1 %vm68_vm0, %v698_v57 }
 0xd84   :  { %2142 = vmatpush3.msra.mxu1 %v2454_v2  ;;  %2149 = vmatprep.mubr.msk.f32.mxu1 %vm2386_vm1, %v2385_v3  ;;  %v185_v2 = vadd.f32 %v2579_v58, %v2519_v12 }
 0xd85   :  { %2143 = vmatprep.subr.mxu1 %v2385_v3 }
 0xd86   :  { %2144 = vmatpush3.msra.mxu1 %v2460_v4 }
 0xd87   :  { %2145 = vmatprep.subr.mxu1 %v2385_v3 }
 0xd88   :  { %2146 = vmatpush3.msra.mxu1 %v2477_v8 }
 0xd89   :  { %2147 = vmatprep.subr.mxu1 %v2385_v3 }
 0xd8a   :  { %2148 = vmatpush3.msra.mxu1 %v2487_v10 }
 0xd8b   :  { %2163 = vmatprep.subr.mxu1 %v2385_v3 }
 0xe43   :  { %v767_v59 = vpop.f32.mrf.mxu1 }
 0xe44   :  { %v771_v62 = vadd.f32 %v767_v59, %v185_v2  ;;  %v1928_v59 = vld [vmem:[%s2885_s6] ss:$0 sm:$0xff] }
 0xe45   :  { %v2129_v63 = vpop.f32.mrf.mxu1 }
 0xe46   :  { %2307 = vtanh.f32 %v771_v62  ;;  %v1923_v4 = vmul.f32 -1.442695, %v771_v62 }
 0xe48   :  { %2309 = vpow2.f32 %v1923_v4 }
 0xe53   :  { %v2308_v0 = vpop.eup %2307 }
 0xe54   :  { %781 = vrot.lane.b32.xlu0 %v2308_v0, %s2387_s13 }
 0xe55   :  { %v2310_v1 = vpop.eup %2309 }
 0xe56   :  { %v775_v8 = vadd.f32 1.0, %v2310_v1 }
 0xe58   :  { %2311 = vrcp.f32 %v775_v8 }
 0xe65   :  { %v2312_v5 = vpop.eup %2311 }
 0xe66   :  { %v779_v7 = vmul.f32 %v2312_v5, %v689_v53 }
 0xec6   :  { %v782_v6 = vpop.permute.xlu0 %781 }
 0xec7   :  { %v784_v10 = vmul.f32 %v2312_v5, %v782_v6 }
 0xec9   :  { %786 = vrot.lane.b32.xlu1 %v784_v10, %s2388_s3 }
 0xf3b   :  { %v787_v9 = vpop.permute.xlu1 %786 }
 0xf3c   :  { %v789_v58 = vadd.f32 %v787_v9, %v779_v7 }
 0xf3e   :  { %2313 = vtanh.f32 %v789_v58 }
 0xf4b   :  { %v2314_v11 = vpop.eup %2313 }
 0xf4c   :  { %792 = vrot.lane.b32.xlu0 %v2314_v11, %s2387_s13 }
 0xfbe   :  { %v793_v13 = vpop.permute.xlu0 %792 }
 0xfbf   :  { %v795_v14 = vmul.f32 %v2312_v5, %v793_v13 }
 0xfc1   :  { %797 = vrot.lane.b32.xlu1 %v795_v14, %s2388_s3 }
0x1033   :  { %v798_v15 = vpop.permute.xlu1 %797 }
0x1034   :  { %2139 = vmatmul.mubr.msk.f32.vlgmr.msra.gmra.mxu0 %vm68_vm0, %v798_v15 }
0x1035   :  { %2160 = vmatprep.mubr.msk.f32.mxu0 %vm2386_vm1, %v2385_v3  ;;  %2153 = vmatpush3.msra.mxu0 %v48_v60 }
0x1036   :  { %2154 = vmatprep.subr.mxu0 %v2385_v3 }
0x1037   :  { %2155 = vmatpush3.msra.mxu0 %v47_v47 }
0x1038   :  { %2156 = vmatprep.subr.mxu0 %v2385_v3 }
0x1039   :  { %2157 = vmatpush3.msra.mxu0 %v46_v49 }
0x103a   :  { %2158 = vmatprep.subr.mxu0 %v2385_v3 }
0x103b   :  { %2159 = vmatpush3.msra.mxu0 %v45_v51 }
0x103c   :  { %2174 = vmatprep.subr.mxu0 %v2385_v3 }
0x10f4   :  { %v867_v17 = vpop.f32.mrf.mxu0 }
0x10f5   :  { %v871_v18 = vadd.f32 %v867_v17, %v190_v16 }
0x10f6   :  { %v2140_v19 = vpop.f32.mrf.mxu0 }
0x10f7   :  { %2315 = vtanh.f32 %v871_v18  ;;  %v1925_v21 = vmul.f32 -1.442695, %v871_v18 }
0x10f9   :  { %2317 = vpow2.f32 %v1925_v21 }
0x1104   :  { %v2316_v20 = vpop.eup %2315 }
0x1105   :  { %881 = vrot.lane.b32.xlu0 %v2316_v20, %s2387_s13 }
0x1106   :  { %v2318_v22 = vpop.eup %2317 }
0x1107   :  { %v875_v23 = vadd.f32 1.0, %v2318_v22 }
0x1109   :  { %2319 = vrcp.f32 %v875_v23 }
0x1116   :  { %v2320_v24 = vpop.eup %2319 }
0x1117   :  { %v879_v27 = vmul.f32 %v2320_v24, %v789_v58 }
0x1177   :  { %v882_v25 = vpop.permute.xlu0 %881 }
0x1178   :  { %v884_v26 = vmul.f32 %v2320_v24, %v882_v25 }
0x117a   :  { %886 = vrot.lane.b32.xlu1 %v884_v26, %s2388_s3 }
0x11ec   :  { %v887_v28 = vpop.permute.xlu1 %886 }
0x11ed   :  { %v889_v61 = vadd.f32 %v887_v28, %v879_v27 }
0x11ef   :  { %2321 = vtanh.f32 %v889_v61 }
0x11fc   :  { %v2322_v29 = vpop.eup %2321 }
0x11fd   :  { %892 = vrot.lane.b32.xlu0 %v2322_v29, %s2387_s13 }
0x126f   :  { %v893_v30 = vpop.permute.xlu0 %892 }
0x1270   :  { %v895_v31 = vmul.f32 %v2320_v24, %v893_v30 }
0x1272   :  { %897 = vrot.lane.b32.xlu1 %v895_v31, %s2388_s3 }
0x12e4   :  { %v898_v32 = vpop.permute.xlu1 %897 }
0x12e5   :  { %2150 = vmatmul.mubr.msk.f32.vlgmr.msra.gmra.mxu1 %vm68_vm0, %v898_v32 }
0x12e6   :  { %2171 = vmatprep.mubr.msk.f32.mxu1 %vm2386_vm1, %v2385_v3  ;;  %2164 = vmatpush3.msra.mxu1 %v2664_v46 }
0x12e7   :  { %2165 = vmatprep.subr.mxu1 %v2385_v3 }
0x12e8   :  { %2166 = vmatpush3.msra.mxu1 %v2673_v48 }
0x12e9   :  { %2167 = vmatprep.subr.mxu1 %v2385_v3 }
0x12ea   :  { %2168 = vmatpush3.msra.mxu1 %v2683_v50 }
0x12eb   :  { %2169 = vmatprep.subr.mxu1 %v2385_v3 }
0x12ec   :  { %2170 = vmatpush3.msra.mxu1 %v2694_v52 }
0x12ed   :  { %2172 = vmatmul.mubr.f32.vlgmr.msra.gmra.mxu1 %v2385_v3  ;;  %2185 = vmatprep.subr.mxu1 %v2385_v3 }
0x12ee   :  { %2193 = vmatprep.mubr.msk.f32.mxu1 %vm2386_vm1, %v2385_v3  ;;  %2186 = vmatpush3.msra.mxu1 %v2664_v46 }
0x12ef   :  { %2187 = vmatprep.subr.mxu1 %v2385_v3 }
0x12f0   :  { %2188 = vmatpush3.msra.mxu1 %v2673_v48 }
0x12f1   :  { %2189 = vmatprep.subr.mxu1 %v2385_v3 }
0x12f2   :  { %2190 = vmatpush3.msra.mxu1 %v2683_v50 }
0x12f3   :  { %2191 = vmatprep.subr.mxu1 %v2385_v3 }
0x12f4   :  { %2192 = vmatpush3.msra.mxu1 %v2694_v52 }
0x12f5   :  { %2207 = vmatprep.subr.mxu1 %v2385_v3 }
0x13a5   :  { %v967_v34 = vpop.f32.mrf.mxu1 }
0x13a6   :  { %v971_v35 = vadd.f32 %v967_v34, %v195_v33 }
0x13a7   :  { %v2151_v36 = vpop.f32.mrf.mxu1 }
0x13a8   :  { %2323 = vtanh.f32 %v971_v35  ;;  %v1927_v38 = vmul.f32 -1.442695, %v971_v35 }
0x13aa   :  { %2325 = vpow2.f32 %v1927_v38 }
0x13ad   :  { %v1143_v57 = vpop.f32.mrf.mxu1 }
0x13af   :  { %v2173_v2 = vpop.f32.mrf.mxu1 }
0x13b0   :  { %v1575_v2 = vld [vmem:[%s2886_s7 + $0x10] sm:$0xff] }
0x13b5   :  { %v2324_v37 = vpop.eup %2323 }
0x13b6   :  { %981 = vrot.lane.b32.xlu0 %v2324_v37, %s2387_s13 }
0x13b7   :  { %v2326_v39 = vpop.eup %2325 }
0x13b8   :  { %v975_v40 = vadd.f32 1.0, %v2326_v39 }
0x13ba   :  { %2327 = vrcp.f32 %v975_v40 }
0x13c7   :  { %v2328_v41 = vpop.eup %2327 }
0x13c8   :  { %v979_v44 = vmul.f32 %v2328_v41, %v889_v61 }
0x1428   :  { %v982_v42 = vpop.permute.xlu0 %981 }
0x1429   :  { %v984_v43 = vmul.f32 %v2328_v41, %v982_v42 }
0x142b   :  { %986 = vrot.lane.b32.xlu1 %v984_v43, %s2388_s3 }
0x149d   :  { %v987_v45 = vpop.permute.xlu1 %986 }
0x149e   :  { %v989_v12 = vadd.f32 %v987_v45, %v979_v44 }
0x14a0   :  { %2329 = vtanh.f32 %v989_v12 }
0x14ad   :  { %v2330_v53 = vpop.eup %2329 }
0x14ae   :  { %992 = vrot.lane.b32.xlu0 %v2330_v53, %s2387_s13 }
0x1520   :  { %v993_v54 = vpop.permute.xlu0 %992 }
0x1521   :  { %v2714_v55 = vmul.f32 %v2328_v41, %v993_v54  ;;  %v1576_v54 = vld [vmem:[%s2886_s7 + $0x18] sm:$0xff] }
0x1523   :  { %1003 = vrot.lane.b32.xlu1 %v2714_v55, %s2388_s3 }
0x1595   :  { %v2718_v56 = vpop.permute.xlu1 %1003 }
0x1596   :  { %2161 = vmatmul.mubr.msk.f32.vlgmr.msra.gmra.mxu0 %vm68_vm0, %v2718_v56 }
0x1597   :  { %2175 = vmatpush3.msra.mxu0 %v2664_v46  ;;  %2182 = vmatprep.mubr.msk.f32.mxu0 %vm2386_vm1, %v2385_v3 }
0x1598   :  { %2176 = vmatprep.subr.mxu0 %v2385_v3 }
0x1599   :  { %2177 = vmatpush3.msra.mxu0 %v2673_v48 }
0x159a   :  { %2178 = vmatprep.subr.mxu0 %v2385_v3 }
0x159b   :  { %2179 = vmatpush3.msra.mxu0 %v2683_v50 }
0x159c   :  { %2180 = vmatprep.subr.mxu0 %v2385_v3 }
0x159d   :  { %2181 = vmatpush3.msra.mxu0 %v2694_v52 }
0x159e   :  { %2196 = vmatprep.subr.mxu0 %v2385_v3 }
0x1656   :  { %v1073_v62 = vpop.f32.mrf.mxu0 }
0x1657   :  { %v2735_v63 = vadd.f32 %v1928_v59, %v1073_v62  ;;  %v1574_v59 = vld [vmem:[%s2886_s7 + $0x8] sm:$0xff]  ;;  %v1573_v62 = vld [vmem:[%s2886_s7] sm:$0xff] }
0x1658   :  { %v2162_v0 = vpop.f32.mrf.mxu0 }
0x1659   :  { %v1147_v4 = vadd.f32 %v1143_v57, %v2735_v63 }
0x165b   :  { %2331 = vtanh.f32 %v1147_v4  ;;  %v1930_v8 = vmul.f32 -1.442695, %v1147_v4 }
0x165d   :  { %2333 = vpow2.f32 %v1930_v8 }
0x1668   :  { %v2332_v1 = vpop.eup %2331 }
0x1669   :  { %1157 = vrot.lane.b32.xlu0 %v2332_v1, %s2387_s13 }
0x166a   :  { %v2334_v5 = vpop.eup %2333 }
0x166b   :  { %v1151_v6 = vadd.f32 1.0, %v2334_v5 }
0x166d   :  { %2335 = vrcp.f32 %v1151_v6 }
0x167a   :  { %v2336_v10 = vpop.eup %2335 }
0x167b   :  { %v1155_v58 = vmul.f32 0.0, %v2336_v10 }
0x16db   :  { %v1158_v7 = vpop.permute.xlu0 %1157 }
0x16dc   :  { %v1160_v9 = vmul.f32 %v2336_v10, %v1158_v7 }
0x16de   :  { %1162 = vrot.lane.b32.xlu1 %v1160_v9, %s2388_s3 }
0x1750   :  { %v1163_v11 = vpop.permute.xlu1 %1162 }
0x1751   :  { %v1165_v13 = vadd.f32 %v1163_v11, %v1155_v58 }
0x1753   :  { %2337 = vtanh.f32 %v1165_v13  ;;  %v1259_v61 = vrot.slane %v1165_v13, 7 }
0x1760   :  { %v2338_v14 = vpop.eup %2337 }
0x1761   :  { %1168 = vrot.lane.b32.xlu0 %v2338_v14, %s2387_s13 }
0x17d3   :  { %v1169_v15 = vpop.permute.xlu0 %1168 }
0x17d4   :  { %v1171_v16 = vmul.f32 %v2336_v10, %v1169_v15 }
0x17d6   :  { %1173 = vrot.lane.b32.xlu1 %v1171_v16, %s2388_s3 }
0x1848   :  { %v1174_v17 = vpop.permute.xlu1 %1173 }
0x1849   :  { %2183 = vmatmul.mubr.msk.f32.vlgmr.msra.gmra.mxu0 %vm68_vm0, %v1174_v17  ;;  %v1495_v17 = vld [vmem:[%s2887_s8 + $0x18] sm:$0xff] }
0x184a   :  { %2197 = vmatpush3.msra.mxu0 %v2664_v46  ;;  %2204 = vmatprep.mubr.msk.f32.mxu0 %vm2386_vm1, %v2385_v3 }
0x184b   :  { %2198 = vmatprep.subr.mxu0 %v2385_v3 }
0x184c   :  { %2199 = vmatpush3.msra.mxu0 %v2673_v48 }
0x184d   :  { %2200 = vmatprep.subr.mxu0 %v2385_v3 }
0x184e   :  { %2201 = vmatpush3.msra.mxu0 %v2683_v50 }
0x184f   :  { %2202 = vmatprep.subr.mxu0 %v2385_v3 }
0x1850   :  { %2203 = vmatpush3.msra.mxu0 %v2694_v52 }
0x1851   :  { %2218 = vmatprep.subr.mxu0 %v2385_v3 }
0x1909   :  { %v1243_v18 = vpop.f32.mrf.mxu0 }
0x190a   :  { %v1248_v19 = vrot.slane %v1243_v18, 7  ;;  %v1494_v18 = vld [vmem:[%s2887_s8 + $0x10] sm:$0xff] }
0x190b   :  { %v2184_v20 = vpop.f32.mrf.mxu0 }
0x190c   :  { %v1250_v21 = vadd.f32 %v1248_v19, %v2735_v63  ;;  %v1584_v19 = vld [vmem:[%s2886_s7 + $0x58] sm:$0xff]  ;;  %v1583_v20 = vld [vmem:[%s2886_s7 + $0x50] sm:$0xff] }
0x190e   :  { %2339 = vtanh.f32 %v1250_v21  ;;  %v1932_v23 = vmul.f32 -1.442695, %v1250_v21  ;;  %v1493_v21 = vld [vmem:[%s2887_s8 + $0x8] sm:$0xff] }
0x1910   :  { %2341 = vpow2.f32 %v1932_v23  ;;  %v1492_v23 = vld [vmem:[%s2887_s8] sm:$0xff] }
0x191b   :  { %v2340_v22 = vpop.eup %2339 }
0x191c   :  { %1263 = vrot.lane.b32.xlu0 %v2340_v22, %s2387_s13 }
0x191d   :  { %v2342_v24 = vpop.eup %2341 }
0x191e   :  { %v1254_v25 = vadd.f32 1.0, %v2342_v24  ;;  %v1660_v24 = vrot.slane %v2714_v55, 1 }
0x1920   :  { %2343 = vrcp.f32 %v1254_v25  ;;  %v1812_v25 = vrot.slane %v2714_v55, 3 }
0x192d   :  { %v2344_v26 = vpop.eup %2343 }
0x192e   :  { %v1261_v29 = vmul.f32 %v2344_v26, %v1259_v61 }
0x198e   :  { %v1264_v27 = vpop.permute.xlu0 %1263 }
0x198f   :  { %v1266_v28 = vmul.f32 %v2344_v26, %v1264_v27  ;;  %v1581_v27 = vld [vmem:[%s2886_s7 + $0x40] sm:$0xff] }
0x1991   :  { %1268 = vrot.lane.b32.xlu1 %v1266_v28, %s2388_s3 }
0x1a03   :  { %v1269_v30 = vpop.permute.xlu1 %1268 }
0x1a04   :  { %v1271_v31 = vadd.f32 %v1269_v30, %v1261_v29  ;;  %v1736_v30 = vrot.slane %v2714_v55, 2  ;;  %v1578_v55 = vld [vmem:[%s2886_s7 + $0x28] sm:$0xff] }
0x1a06   :  { %2345 = vtanh.f32 %v1271_v31  ;;  %v1366_v46 = vrot.slane %v1271_v31, 7  ;;  %v1580_v31 = vld [vmem:[%s2886_s7 + $0x38] sm:$0xff] }
0x1a13   :  { %v2346_v32 = vpop.eup %2345 }
0x1a14   :  { %1274 = vrot.lane.b32.xlu0 %v2346_v32, %s2387_s13 }
0x1a86   :  { %v1275_v33 = vpop.permute.xlu0 %1274 }
0x1a87   :  { %v1277_v34 = vmul.f32 %v2344_v26, %v1275_v33  ;;  %v1582_v26 = vld [vmem:[%s2886_s7 + $0x48] sm:$0xff]  ;;  %v1579_v33 = vld [vmem:[%s2886_s7 + $0x30] sm:$0xff] }
0x1a89   :  { %v1279_v35 = vrot.slane %v1277_v34, 1 }
0x1a8b   :  { %1280 = vrot.lane.b32.xlu1 %v1279_v35, %s2388_s3  ;;  %v1577_v35 = vld [vmem:[%s2886_s7 + $0x20] sm:$0xff] }
0x1afd   :  { %v1281_v36 = vpop.permute.xlu1 %1280 }
0x1afe   :  { %2194 = vmatmul.mubr.msk.f32.vlgmr.msra.gmra.mxu1 %vm68_vm0, %v1281_v36  ;;  %v1588_v36 = vld [vmem:[%s2886_s7 + $0x78] sm:$0xff] }
0x1aff   :  { %2215 = vmatprep.mubr.msk.f32.mxu1 %vm2386_vm1, %v2385_v3  ;;  %2208 = vmatpush3.msra.mxu1 %v1495_v17 }
0x1b00   :  { %2209 = vmatprep.subr.mxu1 %v2385_v3 }
0x1b01   :  { %2210 = vmatpush3.msra.mxu1 %v1494_v18 }
0x1b02   :  { %2211 = vmatprep.subr.mxu1 %v2385_v3 }
0x1b03   :  { %2212 = vmatpush3.msra.mxu1 %v1493_v21 }
0x1b04   :  { %2213 = vmatprep.subr.mxu1 %v2385_v3 }
0x1b05   :  { %2214 = vmatpush3.msra.mxu1 %v1492_v23 }
0x1b06   :  { %2229 = vmatprep.subr.mxu1 %v2385_v3 }
0x1bbe   :  { %v1350_v37 = vpop.f32.mrf.mxu1 }
0x1bbf   :  { %v1355_v38 = vrot.slane %v1350_v37, 6 }
0x1bc0   :  { %v2195_v39 = vpop.f32.mrf.mxu1 }
0x1bc1   :  { %v1357_v40 = vadd.f32 %v1355_v38, %v2735_v63  ;;  %v1587_v38 = vld [vmem:[%s2886_s7 + $0x70] sm:$0xff]  ;;  %v1586_v39 = vld [vmem:[%s2886_s7 + $0x68] sm:$0xff] }
0x1bc3   :  { %2347 = vtanh.f32 %v1357_v40  ;;  %v1934_v42 = vmul.f32 -1.442695, %v1357_v40  ;;  %v1585_v40 = vld [vmem:[%s2886_s7 + $0x60] sm:$0xff]  ;;  %s2389_s7 = smov [#allocation2]  }
0x1bc4   :  { %s1896_s12 = sshll.u32 %s2389_s7, 4  ;;  %s1897_s12 = int_to_ptr.vmem [resolvable:$true] %s1896_s12 }
0x1bc5   :  { %2349 = vpow2.f32 %v1934_v42  ;;  %s2363_s1 = scalar_lea.vmem %s1897_s12, 16  ;;  %p2368_p1 = scmp.lt.s32.totalorder %s1897_s12, %s1897_s12 }
0x1bc6   :  { %p2364_p0 = scmp.ne.s32.totalorder %s1897_s12, %s2363_s1 }
0x1bd0   :  { %v2348_v41 = vpop.eup %2347 }
0x1bd1   :  { %1370 = vrot.lane.b32.xlu0 %v2348_v41, %s2387_s13 }
0x1bd2   :  { %v2350_v43 = vpop.eup %2349 }
0x1bd3   :  { %v1361_v44 = vadd.f32 1.0, %v2350_v43  ;;  %v1496_v43 = vld [vmem:[%s2888_s9] sm:$0x1]  ;;  %s2367_s9 = scalar_lea.vmem %s1897_s12, 32 }
0x1bd4   :  { %p2369_p2 = scmp.lt.s32.totalorder %s2367_s9, %s2363_s1 }
0x1bd5   :  { %2351 = vrcp.f32 %v1361_v44 }
0x1bd6   :  { %p2370_p3 = por %p2369_p2, %p2368_p1 }
0x1bd8   :  { %p2371_p4 = pnand %p2370_p3, %p2364_p0 }
0x1be2   :  { %v2352_v45 = vpop.eup %2351 }
0x1be3   :  { %v1368_v47 = vmul.f32 %v2352_v45, %v1366_v46 }
0x1c43   :  { %v1371_v12 = vpop.permute.xlu0 %1370 }
0x1c44   :  { %v1373_v60 = vmul.f32 %v2352_v45, %v1371_v12 }
0x1c46   :  { %1375 = vrot.lane.b32.xlu1 %v1373_v60, %s2388_s3 }
0x1cb8   :  { %v1376_v48 = vpop.permute.xlu1 %1375 }
0x1cb9   :  { %v1378_v49 = vadd.f32 %v1376_v48, %v1368_v47 }
0x1cbb   :  { %2353 = vtanh.f32 %v1378_v49  ;;  %v1473_v14 = vrot.slane %v1378_v49, 7 }
0x1cc8   :  { %v2354_v50 = vpop.eup %2353 }
0x1cc9   :  { %1381 = vrot.lane.b32.xlu0 %v2354_v50, %s2387_s13 }
0x1d3b   :  { %v1382_v51 = vpop.permute.xlu0 %1381 }
0x1d3c   :  { %v1384_v52 = vmul.f32 %v2352_v45, %v1382_v51 }
0x1d3e   :  { %v1386_v53 = vrot.slane %v1384_v52, 2 }
0x1d40   :  { %1387 = vrot.lane.b32.xlu1 %v1386_v53, %s2388_s3 }
0x1db2   :  { %v1388_v57 = vpop.permute.xlu1 %1387 }
0x1db3   :  { %2205 = vmatmul.mubr.msk.f32.vlgmr.msra.gmra.mxu0 %vm68_vm0, %v1388_v57 }
0x1db4   :  { %2219 = vmatpush3.msra.mxu0 %v1576_v54  ;;  %2226 = vmatprep.mubr.msk.f32.mxu0 %vm2386_vm1, %v2385_v3 }
0x1db5   :  { %2220 = vmatprep.subr.mxu0 %v2385_v3 }
0x1db6   :  { %2221 = vmatpush3.msra.mxu0 %v1575_v2 }
0x1db7   :  { %2222 = vmatprep.subr.mxu0 %v2385_v3 }
0x1db8   :  { %2223 = vmatpush3.msra.mxu0 %v1574_v59 }
0x1db9   :  { %2224 = vmatprep.subr.mxu0 %v2385_v3 }
0x1dba   :  { %2225 = vmatpush3.msra.mxu0 %v1573_v62 }
0x1dbb   :  { %2227 = vmatmul.mubr.msk.f32.vlgmr.msra.gmra.mxu0 %vm68_vm0, %v2718_v56  ;;  %2240 = vmatprep.subr.mxu0 %v2385_v3 }
0x1dbc   :  { %2248 = vmatprep.mubr.msk.f32.mxu0 %vm2386_vm1, %v2385_v3  ;;  %2241 = vmatpush3.msra.mxu0 %v1584_v19 }
0x1dbd   :  { %2242 = vmatprep.subr.mxu0 %v2385_v3 }
0x1dbe   :  { %2243 = vmatpush3.msra.mxu0 %v1583_v20 }
0x1dbf   :  { %2244 = vmatprep.subr.mxu0 %v2385_v3 }
0x1dc0   :  { %2245 = vmatpush3.msra.mxu0 %v1582_v26 }
0x1dc1   :  { %2246 = vmatprep.subr.mxu0 %v2385_v3 }
0x1dc2   :  { %2247 = vmatpush3.msra.mxu0 %v1581_v27 }
0x1e73   :  { %v1457_v0 = vpop.f32.mrf.mxu0 }
0x1e74   :  { %v1462_v4 = vrot.slane %v1457_v0, 5 }
0x1e75   :  { %v2206_v1 = vpop.f32.mrf.mxu0 }
0x1e76   :  { %v1464_v8 = vadd.f32 %v1462_v4, %v2735_v63 }
0x1e78   :  { %2355 = vtanh.f32 %v1464_v8  ;;  %v1936_v7 = vmul.f32 -1.442695, %v1464_v8 }
0x1e7a   :  { %2357 = vpow2.f32 %v1936_v7 }
0x1e7b   :  { %v2790_v5 = vpop.f32.mrf.mxu0 }
0x1e7d   :  { %v2228_v6 = vpop.f32.mrf.mxu0 }
0x1e85   :  { %v2356_v10 = vpop.eup %2355 }
0x1e86   :  { %1477 = vrot.lane.b32.xlu0 %v2356_v10, %s2387_s13 }
0x1e87   :  { %v2358_v56 = vpop.eup %2357 }
0x1e88   :  { %v1468_v9 = vadd.f32 1.0, %v2358_v56 }
0x1e8a   :  { %2359 = vrcp.f32 %v1468_v9 }
0x1e97   :  { %v2360_v58 = vpop.eup %2359 }
0x1e98   :  { %v1475_v15 = vmul.f32 %v2360_v58, %v1473_v14 }
0x1ef8   :  { %v1478_v11 = vpop.permute.xlu0 %1477 }
0x1ef9   :  { %v1480_v13 = vmul.f32 %v2360_v58, %v1478_v11 }
0x1efb   :  { %1482 = vrot.lane.b32.xlu1 %v1480_v13, %s2388_s3 }
0x1f6d   :  { %v1483_v63 = vpop.permute.xlu1 %1482 }
0x1f6e   :  { %v1485_v16 = vadd.f32 %v1483_v63, %v1475_v15 }
0x1f70   :  { %2361 = vtanh.f32 %v1485_v16 }
0x1f7d   :  { %v2362_v22 = vpop.eup %2361 }
0x1f7e   :  { %1488 = vrot.lane.b32.xlu0 %v2362_v22, %s2387_s13 }
0x1f82   :  { %1661 = vrot.lane.b32.xlu0 %v1660_v24, %s2388_s3 }
0x1f86   :  { %1813 = vrot.lane.b32.xlu0 %v1812_v25, %s2388_s3 }
0x1ff0   :  { %v1489_v28 = vpop.permute.xlu0 %1488 }
0x1ff1   :  { %v1491_v61 = vmul.f32 %v2360_v58, %v1489_v28 }
0x1ff3   :  { %v1498_v29 = vrot.slane %v1491_v61, 3 }
0x1ff4   :  { %v1662_v37 = vpop.permute.xlu0 %1661 }
0x1ff5   :  { %1499 = vrot.lane.b32.xlu1 %v1498_v29, %s2388_s3 }
0x1ff8   :  { %v1814_v41 = vpop.permute.xlu0 %1813 }
0x1ff9   :  { %1737 = vrot.lane.b32.xlu1 %v1736_v30, %s2388_s3 }
0x2067   :  { %v1500_v32 = vpop.permute.xlu1 %1499 }
0x2068   :  { %2216 = vmatmul.mubr.msk.f32.vlgmr.msra.gmra.mxu1 %vm68_vm0, %v1500_v32 }
0x2069   :  { %2230 = vmatpush3.msra.mxu1 %v1580_v31  ;;  %2237 = vmatprep.mubr.msk.f32.mxu1 %vm2386_vm1, %v2385_v3 }
0x206a   :  { %2231 = vmatprep.subr.mxu1 %v2385_v3 }
0x206b   :  { %2232 = vmatpush3.msra.mxu1 %v1579_v33  ;;  %v1738_v34 = vpop.permute.xlu1 %1737 }
0x206c   :  { %2233 = vmatprep.subr.mxu1 %v2385_v3  ;;  %2249 = vmatmul.mubr.msk.f32.vlgmr.msra.gmra.mxu0 %vm68_vm0, %v1738_v34 }
0x206d   :  { %2234 = vmatpush3.msra.mxu1 %v1578_v55 }
0x206e   :  { %2235 = vmatprep.subr.mxu1 %v2385_v3 }
0x206f   :  { %2236 = vmatpush3.msra.mxu1 %v1577_v35 }
0x2070   :  { %2238 = vmatmul.mubr.msk.f32.vlgmr.msra.gmra.mxu1 %vm68_vm0, %v1662_v37  ;;  %2251 = vmatprep.subr.mxu1 %v2385_v3 }
0x2071   :  { %2252 = vmatpush3.msra.mxu1 %v1588_v36  ;;  %2259 = vmatprep.mubr.msk.f32.mxu1 %vm2386_vm1, %v2385_v3 }
0x2072   :  { %2253 = vmatprep.subr.mxu1 %v2385_v3 }
0x2073   :  { %2254 = vmatpush3.msra.mxu1 %v1587_v38 }
0x2074   :  { %2255 = vmatprep.subr.mxu1 %v2385_v3 }
0x2075   :  { %2256 = vmatpush3.msra.mxu1 %v1586_v39 }
0x2076   :  { %2257 = vmatprep.subr.mxu1 %v2385_v3 }
0x2077   :  { %2258 = vmatpush3.msra.mxu1 %v1585_v40 }
0x2078   :  { %2260 = vmatmul.mubr.msk.f32.vlgmr.msra.gmra.mxu1 %vm68_vm0, %v1814_v41 }
0x2128   :  { %v1569_v42 = vpop.f32.mrf.mxu1 }
0x2129   :  { %v1570_v12 = vadd.f32 %v1569_v42, %v1496_v43 }
0x212a   :  { %v2217_v44 = vpop.f32.mrf.mxu1 }
0x212b   :  { %v1659_v47 = vadd.f32 %v2790_v5, %v1570_v12 }
0x212c   :  { %v1807_v45 = vpop.f32.mrf.mxu0 }
0x212e   :  { %v2250_v60 = vpop.f32.mrf.mxu0 }
0x2130   :  { %v1731_v46 = vpop.f32.mrf.mxu1 }
0x2131   :  { %v1735_v49 = vadd.f32 %v1731_v46, %v1659_v47 }
0x2132   :  { %v2239_v48 = vpop.f32.mrf.mxu1 }
0x2133   :  { %v1811_v3 = vadd.f32 %v1807_v45, %v1735_v49 }
0x2138   :  { %v1883_v50 = vpop.f32.mrf.mxu1 }
0x2139   :  { %v1887_v51 = vadd.f32 %v1883_v50, %v1811_v3 }
0x213a   :  { %v2261_v52 = vpop.f32.mrf.mxu1 }
0x213b   :  { %1889 = vst.msk [vmem:[#allocation2] sm:$0x1] %vm1888_vm2, %v1887_v51 }
0x213c   :  { %2374 = shalt.err (!%p2371_p4)
}
0x213d   :  { %1899 = dma.vmem_to_hbm [thread:$0]  %s1897_s12, 16, %s2889_s10, [#allocation3]  }
0x213e   :  { %2383 = dma.done.wait [#allocation3], 16  }
0x213f   :  { %2384 = vsyncadd [#allocation3], 4294967280 }
0x2140   :  { %1903 = vsyncpa [#allocation3], 1 }

</bundles_post_ra>
